<compile_context>
chip_gen: v6e
topology: v6e:2x2x1
jax: 0.10.0
libtpu: 0.0.40
codegen_flags: <defaults>
</compile_context>

<pallas_src>
import functools

import jax
import jax.numpy as jnp
from jax.experimental import pallas as pl
from jax.experimental.pallas import tpu as pltpu


# per-tensor activation quantization params (deterministic "calibration")
ACT_S0, ACT_Z0 = 4.0 / 255.0, 128   # QuantStub scale / zero_point (quint8)
ACT_S1, ACT_Z1 = 0.05, 0            # conv1 output (post-ReLU, so zp=0)
ACT_S2, ACT_Z2 = 0.05, 0            # conv2 output

# 3x3 taps in (di, dj) form; tap index t == (di+1)*3 + (dj+1) matches weight layout.
_TAPS = tuple((di, dj) for di in (-1, 0, 1) for dj in (-1, 0, 1))

_HALO = 128   # lane-aligned halo so the center scratch store is 128-aligned


# ------------------------------ fused kernel --------------------------------

def _fused_qmodel_kernel(x_ref, mask_ref, w1_ref, b1_ref, w2_ref, b2_ref,
                         o_ref, pad1_ref, pad2_ref, *,
                         W, M, s0, z0, sw1, s1, z1, sw2, s2, z2):
    """QuantStub -> qconv+ReLU -> qconv+ReLU -> DeQuantStub, fully fused.

    Activations are laid out (C, M) with M = N*H*W (n-major, then h, then w),
    so the long M axis sits on lanes.
    """

    # ---- QuantStub: float -> quint8 codes (held in f32; values are exact ints)
    q = jnp.clip(jnp.round(x_ref[...] * (1.0 / s0)) + float(z0), 0.0, 255.0)

    def qconv_relu_requant(q_in, pad_ref, w_ref, b_ref, z_in, s_in, s_w,
                           s_out, z_out):
        c_out = w_ref.shape[1]
        # Stage CENTERED codes (q - zp_in) in a zero-filled, halo-padded VMEM
        # scratch. The center store is lane-aligned (offset 128, width M);
        # every 3x3 tap then becomes a static lane-offset read. Out-of-range-M
        # taps land in the zero halo (already "centered" zero contribution).
        pad_ref[...] = jnp.zeros(pad_ref.shape, jnp.float32)
        pad_ref[:, pl.ds(_HALO, M)] = q_in - float(z_in)

        acc = jnp.zeros((c_out, M), jnp.float32)
        for t, (di, dj) in enumerate(_TAPS):
            r = di * W + dj                                      # |r| <= W + 1
            shifted = pad_ref[:, pl.ds(_HALO + r, M)]            # (Cin, M)
            valid = mask_ref[pl.ds(t, 1), :]                     # (1, M) in {0,1}
            contrib = shifted * valid                            # exact small ints
            acc = acc + jnp.dot(w_ref[t],                        # (Cout, Cin) bf16
                                contrib.astype(jnp.bfloat16),    # exact: |v| <= 255
                                preferred_element_type=jnp.float32)
        y = acc * (s_in * s_w) + b_ref[...]                      # (Cout, M)
        y = jnp.maximum(y, 0.0)                                  # fused ReLU
        return jnp.clip(jnp.round(y * (1.0 / s_out)) + float(z_out), 0.0, 255.0)

    # features[0..1]: quantized Conv2d + ReLU
    q = qconv_relu_requant(q, pad1_ref, w1_ref, b1_ref, z0, s0, sw1, s1, z1)
    # features[2..3]: quantized Conv2d + ReLU
    q = qconv_relu_requant(q, pad2_ref, w2_ref, b2_ref, z1, s1, sw2, s2, z2)

    # ---- DeQuantStub: quint8 -> float; lane-dense (Cout, M) store to HBM
    o_ref[...] = (q - float(z2)) * s2


# --------------------------------- wrapper ----------------------------------

def _full_spec(shape):
    return pl.BlockSpec(shape, lambda i: (0,) * len(shape))


def quantized_model_forward(x_nchw, params):
    N, C, H, W = x_nchw.shape
    M = N * H * W

    # NCHW (PyTorch) -> (C, M) lane-dense layout, m = n*H*W + h*W + w
    x_cm = jnp.transpose(x_nchw, (1, 0, 2, 3)).reshape(C, M).astype(jnp.float32)

    # Per-tap validity masks: which output pixels have (h+di, w+dj) in-bounds.
    h_idx = jnp.broadcast_to(jnp.arange(H)[None, :, None], (N, H, W)).reshape(M)
    w_idx = jnp.broadcast_to(jnp.arange(W)[None, None, :], (N, H, W)).reshape(M)
    masks = []
    for di, dj in _TAPS:
        ok = ((h_idx + di >= 0) & (h_idx + di < H) &
              (w_idx + dj >= 0) & (w_idx + dj < W))
        masks.append(ok)
    mask = jnp.stack(masks, axis=0).astype(jnp.float32)          # (9, M)

    w1 = params["w1_q"]                                          # (9, 8, 4) bf16 codes
    w2 = params["w2_q"]                                          # (9, 8, 8) bf16 codes
    b1 = params["b1"].reshape(-1, 1).astype(jnp.float32)         # (8, 1)
    b2 = params["b2"].reshape(-1, 1).astype(jnp.float32)         # (8, 1)
    cin1, cmid, cout = w1.shape[2], w2.shape[2], w2.shape[1]

    kern = functools.partial(
        _fused_qmodel_kernel,
        W=W, M=M,
        s0=ACT_S0, z0=ACT_Z0, sw1=params["s_w1"], s1=ACT_S1, z1=ACT_Z1,
        sw2=params["s_w2"], s2=ACT_S2, z2=ACT_Z2)

    out_cm = pl.pallas_call(
        kern,
        out_shape=jax.ShapeDtypeStruct((cout, M), jnp.float32),
        grid=(1,),
        in_specs=[_full_spec(x_cm.shape), _full_spec(mask.shape),
                  _full_spec(w1.shape), _full_spec(b1.shape),
                  _full_spec(w2.shape), _full_spec(b2.shape)],
        out_specs=_full_spec((cout, M)),
        scratch_shapes=[pltpu.VMEM((cin1, M + 2 * _HALO), jnp.float32),
                        pltpu.VMEM((cmid, M + 2 * _HALO), jnp.float32)],
        compiler_params=pltpu.CompilerParams(
            dimension_semantics=("arbitrary",)),
    )(x_cm, mask, w1, b1, w2, b2)

    # (Cout, M) -> NCHW to match PyTorch output convention
    return out_cm.reshape(cout, N, H, W).transpose(1, 0, 2, 3)


# ---------------------- deterministic parameter setup -----------------------

def make_params():
    key = jax.random.PRNGKey(0)
    k1, k2, k3, k4 = jax.random.split(key, 4)
    # PyTorch conv weight convention: (Cout, Cin, KH, KW)
    w1_f = jax.random.normal(k1, (8, 4, 3, 3), jnp.float32) * 0.2
    b1 = jax.random.normal(k2, (8,), jnp.float32) * 0.1
    w2_f = jax.random.normal(k3, (8, 8, 3, 3), jnp.float32) * 0.2
    b2 = jax.random.normal(k4, (8,), jnp.float32) * 0.1

    def quantize_weight(w):
        s = float(jnp.max(jnp.abs(w))) / 127.0
        q = jnp.clip(jnp.round(w / s), -127.0, 127.0)            # int codes in f32
        # (Cout, Cin, KH, KW) -> (KH*KW, Cout, Cin); codes |v|<=127 exact in bf16
        q_taps = jnp.transpose(q, (2, 3, 0, 1)).reshape(9, w.shape[0], w.shape[1])
        return q_taps.astype(jnp.bfloat16), s

    w1_q, s_w1 = quantize_weight(w1_f)
    w2_q, s_w2 = quantize_weight(w2_f)
    return dict(w1_q=w1_q, b1=b1, s_w1=s_w1, w2_q=w2_q, b2=b2, s_w2=s_w2)


# ------------------------------ plain-JAX reference --------------------------

def reference_forward(x_nchw, params):
    """Same quantized math in plain JAX (no Pallas), expressions mirrored exactly."""
    x = jnp.transpose(x_nchw, (0, 2, 3, 1)).astype(jnp.float32)   # NHWC
    q = jnp.clip(jnp.round(x * (1.0 / ACT_S0)) + float(ACT_Z0), 0.0, 255.0)

    def qconv(q, w_taps, b, s_in, z_in, s_w, s_out, z_out):
        N, H, W, Cin = q.shape
        Cout = w_taps.shape[1]
        xp = jnp.pad(q, ((0, 0), (1, 1), (1, 1), (0, 0)),
                     constant_values=float(z_in))
        cols = [xp[:, i:i + H, j:j + W, :] for i in range(3) for j in range(3)]
        p = jnp.concatenate(cols, -1).reshape(N * H * W, 9 * Cin)
        w_mat = jnp.transpose(w_taps.astype(jnp.float32), (0, 2, 1)).reshape(9 * Cin, Cout)
        acc = (p - float(z_in)) @ w_mat
        y = jnp.maximum(acc * (s_in * s_w) + b[None, :], 0.0)
        return jnp.clip(jnp.round(y * (1.0 / s_out)) + float(z_out),
                        0.0, 255.0).reshape(N, H, W, Cout)

    q = qconv(q, params["w1_q"], params["b1"], ACT_S0, ACT_Z0, params["s_w1"],
              ACT_S1, ACT_Z1)
    q = qconv(q, params["w2_q"], params["b2"], ACT_S1, ACT_Z1, params["s_w2"],
              ACT_S2, ACT_Z2)
    y = (q - float(ACT_Z2)) * ACT_S2
    return jnp.transpose(y, (0, 3, 1, 2))


# ----------------------------------- main ------------------------------------

if __name__ == "__main__":
    # TODO(synk): save_params() (pickle file I/O) and the PTQ observer/calibration
    # have no kernel equivalent; activation scales are fixed constants in-script.
    params = make_params()
    x = jax.random.normal(jax.random.PRNGKey(0), (2, 4, 16, 16), jnp.float32)  # NCHW

    fwd = jax.jit(lambda xx: quantized_model_forward(xx, params))
    out = jax.block_until_ready(fwd(x))

    ref = reference_forward(x, params)
    assert out.shape == (2, 8, 16, 16), out.shape
    assert bool(jnp.all(jnp.isfinite(out)))
    assert bool(jnp.allclose(out, ref, atol=1e-4, rtol=1e-4)), "mismatch vs reference"

    print("KERNEL_OK")
</pallas_src>

<mosaic_0001>
module attributes {stable_mosaic.version = 11 : i64} {
  func.func @_fused_qmodel_kernel(%arg0: i32, %arg1: memref<4x512xf32, #tpu.memory_space<vmem>>, %arg2: memref<9x512xf32, #tpu.memory_space<vmem>>, %arg3: memref<9x8x4xbf16, #tpu.memory_space<vmem>>, %arg4: memref<8x1xf32, #tpu.memory_space<vmem>>, %arg5: memref<9x8x8xbf16, #tpu.memory_space<vmem>>, %arg6: memref<8x1xf32, #tpu.memory_space<vmem>>, %arg7: memref<8x512xf32, #tpu.memory_space<vmem>>, %arg8: memref<4x768xf32, #tpu.memory_space<vmem>>, %arg9: memref<8x768xf32, #tpu.memory_space<vmem>>) attributes {dimension_semantics = [#tpu.dimension_semantics<arbitrary>], iteration_bounds = array<i64: 1>, scalar_prefetch = 0 : i64, scratch_operands = 2 : i64, tpu.core_type = #tpu.core_type<tc>, window_params = [{pipeline_mode = #tpu.pipeline_mode<synchronous>, transform_indices = @transform_0, window_bounds = array<i64: 4, 512>}, {pipeline_mode = #tpu.pipeline_mode<synchronous>, transform_indices = @transform_1, window_bounds = array<i64: 9, 512>}, {pipeline_mode = #tpu.pipeline_mode<synchronous>, transform_indices = @transform_2, window_bounds = array<i64: 9, 8, 4>}, {pipeline_mode = #tpu.pipeline_mode<synchronous>, transform_indices = @transform_3, window_bounds = array<i64: 8, 1>}, {pipeline_mode = #tpu.pipeline_mode<synchronous>, transform_indices = @transform_4, window_bounds = array<i64: 9, 8, 8>}, {pipeline_mode = #tpu.pipeline_mode<synchronous>, transform_indices = @transform_5, window_bounds = array<i64: 8, 1>}, {pipeline_mode = #tpu.pipeline_mode<synchronous>, transform_indices = @transform_6, window_bounds = array<i64: 8, 512>}]} {
    %c0 = arith.constant 0 : index
    %c0_0 = arith.constant 0 : index
    %0 = vector.load %arg1[%c0, %c0_0] : memref<4x512xf32, #tpu.memory_space<vmem>>, vector<4x512xf32>
    %cst = arith.constant 6.375000e+01 : f32
    %1 = vector.broadcast %cst : f32 to vector<4x512xf32>
    %2 = arith.mulf %0, %1 : vector<4x512xf32>
    %3 = math.roundeven %2 : vector<4x512xf32>
    %cst_1 = arith.constant 1.280000e+02 : f32
    %4 = vector.broadcast %cst_1 : f32 to vector<4x512xf32>
    %5 = arith.addf %3, %4 : vector<4x512xf32>
    %cst_2 = arith.constant 0.000000e+00 : f32
    %cst_3 = arith.constant 2.550000e+02 : f32
    %6 = vector.broadcast %cst_2 : f32 to vector<4x512xf32>
    %7 = arith.maximumf %6, %5 : vector<4x512xf32>
    %8 = vector.broadcast %cst_3 : f32 to vector<4x512xf32>
    %9 = arith.minimumf %8, %7 : vector<4x512xf32>
    %cst_4 = arith.constant 0.000000e+00 : f32
    %10 = vector.broadcast %cst_4 : f32 to vector<4x768xf32>
    %c0_5 = arith.constant 0 : index
    %c0_6 = arith.constant 0 : index
    %11 = vector.load %arg8[%c0_5, %c0_6] : memref<4x768xf32, #tpu.memory_space<vmem>>, vector<4x768xf32>
    tpu.vector_store %arg8[%c0_5, %c0_6], %10 {strides = array<i32>} : memref<4x768xf32, #tpu.memory_space<vmem>>, vector<4x768xf32>,
    %cst_7 = arith.constant 1.280000e+02 : f32
    %12 = vector.broadcast %cst_7 : f32 to vector<4x512xf32>
    %13 = arith.subf %9, %12 : vector<4x512xf32>
    %c0_8 = arith.constant 0 : index
    %c128 = arith.constant 128 : index
    %14 = vector.load %arg8[%c0_8, %c128] : memref<4x768xf32, #tpu.memory_space<vmem>>, vector<4x512xf32>
    tpu.vector_store %arg8[%c0_8, %c128], %13 {strides = array<i32>} : memref<4x768xf32, #tpu.memory_space<vmem>>, vector<4x512xf32>,
    %cst_9 = arith.constant 0.000000e+00 : f32
    %15 = vector.broadcast %cst_9 : f32 to vector<8x512xf32>
    %c0_10 = arith.constant 0 : index
    %c111 = arith.constant 111 : index
    %16 = vector.load %arg8[%c0_10, %c111] : memref<4x768xf32, #tpu.memory_space<vmem>>, vector<4x512xf32>
    %c0_11 = arith.constant 0 : index
    %c0_12 = arith.constant 0 : index
    %17 = vector.load %arg2[%c0_11, %c0_12] : memref<9x512xf32, #tpu.memory_space<vmem>>, vector<1x512xf32>
    %18 = vector.broadcast %17 : vector<1x512xf32> to vector<4x512xf32>
    %19 = arith.mulf %16, %18 : vector<4x512xf32>
    %c0_13 = arith.constant 0 : index
    %c0_14 = arith.constant 0 : index
    %c0_15 = arith.constant 0 : index
    %20 = vector.load %arg3[%c0_13, %c0_14, %c0_15] : memref<9x8x4xbf16, #tpu.memory_space<vmem>>, vector<1x8x4xbf16>
    %21 = vector.shape_cast %20 : vector<1x8x4xbf16> to vector<8x4xbf16>
    %22 = arith.truncf %19 : vector<4x512xf32> to vector<4x512xbf16>
    %cst_16 = arith.constant dense<0.000000e+00> : vector<8x512xf32>
    %23 = tpu.matmul %21, %22, %cst_16 {dimension_numbers = #tpu.dot_dimension_numbers<[1], [0], [0], [1], [0, 0, 1, 1], [], []>} : vector<8x4xbf16>, vector<4x512xbf16>, vector<8x512xf32> -> vector<8x512xf32>
    %24 = arith.addf %15, %23 : vector<8x512xf32>
    %c0_17 = arith.constant 0 : index
    %c112 = arith.constant 112 : index
    %25 = vector.load %arg8[%c0_17, %c112] : memref<4x768xf32, #tpu.memory_space<vmem>>, vector<4x512xf32>
    %c1 = arith.constant 1 : index
    %c0_18 = arith.constant 0 : index
    %26 = vector.load %arg2[%c1, %c0_18] : memref<9x512xf32, #tpu.memory_space<vmem>>, vector<1x512xf32>
    %27 = vector.broadcast %26 : vector<1x512xf32> to vector<4x512xf32>
    %28 = arith.mulf %25, %27 : vector<4x512xf32>
    %c1_19 = arith.constant 1 : index
    %c0_20 = arith.constant 0 : index
    %c0_21 = arith.constant 0 : index
    %29 = vector.load %arg3[%c1_19, %c0_20, %c0_21] : memref<9x8x4xbf16, #tpu.memory_space<vmem>>, vector<1x8x4xbf16>
    %30 = vector.shape_cast %29 : vector<1x8x4xbf16> to vector<8x4xbf16>
    %31 = arith.truncf %28 : vector<4x512xf32> to vector<4x512xbf16>
    %cst_22 = arith.constant dense<0.000000e+00> : vector<8x512xf32>
    %32 = tpu.matmul %30, %31, %cst_22 {dimension_numbers = #tpu.dot_dimension_numbers<[1], [0], [0], [1], [0, 0, 1, 1], [], []>} : vector<8x4xbf16>, vector<4x512xbf16>, vector<8x512xf32> -> vector<8x512xf32>
    %33 = arith.addf %24, %32 : vector<8x512xf32>
    %c0_23 = arith.constant 0 : index
    %c113 = arith.constant 113 : index
    %34 = vector.load %arg8[%c0_23, %c113] : memref<4x768xf32, #tpu.memory_space<vmem>>, vector<4x512xf32>
    %c2 = arith.constant 2 : index
    %c0_24 = arith.constant 0 : index
    %35 = vector.load %arg2[%c2, %c0_24] : memref<9x512xf32, #tpu.memory_space<vmem>>, vector<1x512xf32>
    %36 = vector.broadcast %35 : vector<1x512xf32> to vector<4x512xf32>
    %37 = arith.mulf %34, %36 : vector<4x512xf32>
    %c2_25 = arith.constant 2 : index
    %c0_26 = arith.constant 0 : index
    %c0_27 = arith.constant 0 : index
    %38 = vector.load %arg3[%c2_25, %c0_26, %c0_27] : memref<9x8x4xbf16, #tpu.memory_space<vmem>>, vector<1x8x4xbf16>
    %39 = vector.shape_cast %38 : vector<1x8x4xbf16> to vector<8x4xbf16>
    %40 = arith.truncf %37 : vector<4x512xf32> to vector<4x512xbf16>
    %cst_28 = arith.constant dense<0.000000e+00> : vector<8x512xf32>
    %41 = tpu.matmul %39, %40, %cst_28 {dimension_numbers = #tpu.dot_dimension_numbers<[1], [0], [0], [1], [0, 0, 1, 1], [], []>} : vector<8x4xbf16>, vector<4x512xbf16>, vector<8x512xf32> -> vector<8x512xf32>
    %42 = arith.addf %33, %41 : vector<8x512xf32>
    %c0_29 = arith.constant 0 : index
    %c127 = arith.constant 127 : index
    %43 = vector.load %arg8[%c0_29, %c127] : memref<4x768xf32, #tpu.memory_space<vmem>>, vector<4x512xf32>
    %c3 = arith.constant 3 : index
    %c0_30 = arith.constant 0 : index
    %44 = vector.load %arg2[%c3, %c0_30] : memref<9x512xf32, #tpu.memory_space<vmem>>, vector<1x512xf32>
    %45 = vector.broadcast %44 : vector<1x512xf32> to vector<4x512xf32>
    %46 = arith.mulf %43, %45 : vector<4x512xf32>
    %c3_31 = arith.constant 3 : index
    %c0_32 = arith.constant 0 : index
    %c0_33 = arith.constant 0 : index
    %47 = vector.load %arg3[%c3_31, %c0_32, %c0_33] : memref<9x8x4xbf16, #tpu.memory_space<vmem>>, vector<1x8x4xbf16>
    %48 = vector.shape_cast %47 : vector<1x8x4xbf16> to vector<8x4xbf16>
    %49 = arith.truncf %46 : vector<4x512xf32> to vector<4x512xbf16>
    %cst_34 = arith.constant dense<0.000000e+00> : vector<8x512xf32>
    %50 = tpu.matmul %48, %49, %cst_34 {dimension_numbers = #tpu.dot_dimension_numbers<[1], [0], [0], [1], [0, 0, 1, 1], [], []>} : vector<8x4xbf16>, vector<4x512xbf16>, vector<8x512xf32> -> vector<8x512xf32>
    %51 = arith.addf %42, %50 : vector<8x512xf32>
    %c0_35 = arith.constant 0 : index
    %c128_36 = arith.constant 128 : index
    %52 = vector.load %arg8[%c0_35, %c128_36] : memref<4x768xf32, #tpu.memory_space<vmem>>, vector<4x512xf32>
    %c4 = arith.constant 4 : index
    %c0_37 = arith.constant 0 : index
    %53 = vector.load %arg2[%c4, %c0_37] : memref<9x512xf32, #tpu.memory_space<vmem>>, vector<1x512xf32>
    %54 = vector.broadcast %53 : vector<1x512xf32> to vector<4x512xf32>
    %55 = arith.mulf %52, %54 : vector<4x512xf32>
    %c4_38 = arith.constant 4 : index
    %c0_39 = arith.constant 0 : index
    %c0_40 = arith.constant 0 : index
    %56 = vector.load %arg3[%c4_38, %c0_39, %c0_40] : memref<9x8x4xbf16, #tpu.memory_space<vmem>>, vector<1x8x4xbf16>
    %57 = vector.shape_cast %56 : vector<1x8x4xbf16> to vector<8x4xbf16>
    %58 = arith.truncf %55 : vector<4x512xf32> to vector<4x512xbf16>
    %cst_41 = arith.constant dense<0.000000e+00> : vector<8x512xf32>
    %59 = tpu.matmul %57, %58, %cst_41 {dimension_numbers = #tpu.dot_dimension_numbers<[1], [0], [0], [1], [0, 0, 1, 1], [], []>} : vector<8x4xbf16>, vector<4x512xbf16>, vector<8x512xf32> -> vector<8x512xf32>
    %60 = arith.addf %51, %59 : vector<8x512xf32>
    %c0_42 = arith.constant 0 : index
    %c129 = arith.constant 129 : index
    %61 = vector.load %arg8[%c0_42, %c129] : memref<4x768xf32, #tpu.memory_space<vmem>>, vector<4x512xf32>
    %c5 = arith.constant 5 : index
    %c0_43 = arith.constant 0 : index
    %62 = vector.load %arg2[%c5, %c0_43] : memref<9x512xf32, #tpu.memory_space<vmem>>, vector<1x512xf32>
    %63 = vector.broadcast %62 : vector<1x512xf32> to vector<4x512xf32>
    %64 = arith.mulf %61, %63 : vector<4x512xf32>
    %c5_44 = arith.constant 5 : index
    %c0_45 = arith.constant 0 : index
    %c0_46 = arith.constant 0 : index
    %65 = vector.load %arg3[%c5_44, %c0_45, %c0_46] : memref<9x8x4xbf16, #tpu.memory_space<vmem>>, vector<1x8x4xbf16>
    %66 = vector.shape_cast %65 : vector<1x8x4xbf16> to vector<8x4xbf16>
    %67 = arith.truncf %64 : vector<4x512xf32> to vector<4x512xbf16>
    %cst_47 = arith.constant dense<0.000000e+00> : vector<8x512xf32>
    %68 = tpu.matmul %66, %67, %cst_47 {dimension_numbers = #tpu.dot_dimension_numbers<[1], [0], [0], [1], [0, 0, 1, 1], [], []>} : vector<8x4xbf16>, vector<4x512xbf16>, vector<8x512xf32> -> vector<8x512xf32>
    %69 = arith.addf %60, %68 : vector<8x512xf32>
    %c0_48 = arith.constant 0 : index
    %c143 = arith.constant 143 : index
    %70 = vector.load %arg8[%c0_48, %c143] : memref<4x768xf32, #tpu.memory_space<vmem>>, vector<4x512xf32>
    %c6 = arith.constant 6 : index
    %c0_49 = arith.constant 0 : index
    %71 = vector.load %arg2[%c6, %c0_49] : memref<9x512xf32, #tpu.memory_space<vmem>>, vector<1x512xf32>
    %72 = vector.broadcast %71 : vector<1x512xf32> to vector<4x512xf32>
    %73 = arith.mulf %70, %72 : vector<4x512xf32>
    %c6_50 = arith.constant 6 : index
    %c0_51 = arith.constant 0 : index
    %c0_52 = arith.constant 0 : index
    %74 = vector.load %arg3[%c6_50, %c0_51, %c0_52] : memref<9x8x4xbf16, #tpu.memory_space<vmem>>, vector<1x8x4xbf16>
    %75 = vector.shape_cast %74 : vector<1x8x4xbf16> to vector<8x4xbf16>
    %76 = arith.truncf %73 : vector<4x512xf32> to vector<4x512xbf16>
    %cst_53 = arith.constant dense<0.000000e+00> : vector<8x512xf32>
    %77 = tpu.matmul %75, %76, %cst_53 {dimension_numbers = #tpu.dot_dimension_numbers<[1], [0], [0], [1], [0, 0, 1, 1], [], []>} : vector<8x4xbf16>, vector<4x512xbf16>, vector<8x512xf32> -> vector<8x512xf32>
    %78 = arith.addf %69, %77 : vector<8x512xf32>
    %c0_54 = arith.constant 0 : index
    %c144 = arith.constant 144 : index
    %79 = vector.load %arg8[%c0_54, %c144] : memref<4x768xf32, #tpu.memory_space<vmem>>, vector<4x512xf32>
    %c7 = arith.constant 7 : index
    %c0_55 = arith.constant 0 : index
    %80 = vector.load %arg2[%c7, %c0_55] : memref<9x512xf32, #tpu.memory_space<vmem>>, vector<1x512xf32>
    %81 = vector.broadcast %80 : vector<1x512xf32> to vector<4x512xf32>
    %82 = arith.mulf %79, %81 : vector<4x512xf32>
    %c7_56 = arith.constant 7 : index
    %c0_57 = arith.constant 0 : index
    %c0_58 = arith.constant 0 : index
    %83 = vector.load %arg3[%c7_56, %c0_57, %c0_58] : memref<9x8x4xbf16, #tpu.memory_space<vmem>>, vector<1x8x4xbf16>
    %84 = vector.shape_cast %83 : vector<1x8x4xbf16> to vector<8x4xbf16>
    %85 = arith.truncf %82 : vector<4x512xf32> to vector<4x512xbf16>
    %cst_59 = arith.constant dense<0.000000e+00> : vector<8x512xf32>
    %86 = tpu.matmul %84, %85, %cst_59 {dimension_numbers = #tpu.dot_dimension_numbers<[1], [0], [0], [1], [0, 0, 1, 1], [], []>} : vector<8x4xbf16>, vector<4x512xbf16>, vector<8x512xf32> -> vector<8x512xf32>
    %87 = arith.addf %78, %86 : vector<8x512xf32>
    %c0_60 = arith.constant 0 : index
    %c145 = arith.constant 145 : index
    %88 = vector.load %arg8[%c0_60, %c145] : memref<4x768xf32, #tpu.memory_space<vmem>>, vector<4x512xf32>
    %c8 = arith.constant 8 : index
    %c0_61 = arith.constant 0 : index
    %89 = vector.load %arg2[%c8, %c0_61] : memref<9x512xf32, #tpu.memory_space<vmem>>, vector<1x512xf32>
    %90 = vector.broadcast %89 : vector<1x512xf32> to vector<4x512xf32>
    %91 = arith.mulf %88, %90 : vector<4x512xf32>
    %c8_62 = arith.constant 8 : index
    %c0_63 = arith.constant 0 : index
    %c0_64 = arith.constant 0 : index
    %92 = vector.load %arg3[%c8_62, %c0_63, %c0_64] : memref<9x8x4xbf16, #tpu.memory_space<vmem>>, vector<1x8x4xbf16>
    %93 = vector.shape_cast %92 : vector<1x8x4xbf16> to vector<8x4xbf16>
    %94 = arith.truncf %91 : vector<4x512xf32> to vector<4x512xbf16>
    %cst_65 = arith.constant dense<0.000000e+00> : vector<8x512xf32>
    %95 = tpu.matmul %93, %94, %cst_65 {dimension_numbers = #tpu.dot_dimension_numbers<[1], [0], [0], [1], [0, 0, 1, 1], [], []>} : vector<8x4xbf16>, vector<4x512xbf16>, vector<8x512xf32> -> vector<8x512xf32>
    %96 = arith.addf %87, %95 : vector<8x512xf32>
    %cst_66 = arith.constant 6.74405164E-5 : f32
    %97 = vector.broadcast %cst_66 : f32 to vector<8x512xf32>
    %98 = arith.mulf %96, %97 : vector<8x512xf32>
    %c0_67 = arith.constant 0 : index
    %c0_68 = arith.constant 0 : index
    %99 = vector.load %arg4[%c0_67, %c0_68] : memref<8x1xf32, #tpu.memory_space<vmem>>, vector<8x1xf32>
    %100 = vector.broadcast %99 : vector<8x1xf32> to vector<8x512xf32>
    %101 = arith.addf %98, %100 : vector<8x512xf32>
    %cst_69 = arith.constant 0.000000e+00 : f32
    %102 = vector.broadcast %cst_69 : f32 to vector<8x512xf32>
    %103 = arith.maximumf %101, %102 : vector<8x512xf32>
    %cst_70 = arith.constant 2.000000e+01 : f32
    %104 = vector.broadcast %cst_70 : f32 to vector<8x512xf32>
    %105 = arith.mulf %103, %104 : vector<8x512xf32>
    %106 = math.roundeven %105 : vector<8x512xf32>
    %cst_71 = arith.constant 0.000000e+00 : f32
    %107 = vector.broadcast %cst_71 : f32 to vector<8x512xf32>
    %108 = arith.addf %106, %107 : vector<8x512xf32>
    %cst_72 = arith.constant 0.000000e+00 : f32
    %cst_73 = arith.constant 2.550000e+02 : f32
    %109 = vector.broadcast %cst_72 : f32 to vector<8x512xf32>
    %110 = arith.maximumf %109, %108 : vector<8x512xf32>
    %111 = vector.broadcast %cst_73 : f32 to vector<8x512xf32>
    %112 = arith.minimumf %111, %110 : vector<8x512xf32>
    %cst_74 = arith.constant 0.000000e+00 : f32
    %113 = vector.broadcast %cst_74 : f32 to vector<8x768xf32>
    %c0_75 = arith.constant 0 : index
    %c0_76 = arith.constant 0 : index
    %114 = vector.load %arg9[%c0_75, %c0_76] : memref<8x768xf32, #tpu.memory_space<vmem>>, vector<8x768xf32>
    tpu.vector_store %arg9[%c0_75, %c0_76], %113 {strides = array<i32>} : memref<8x768xf32, #tpu.memory_space<vmem>>, vector<8x768xf32>,
    %cst_77 = arith.constant 0.000000e+00 : f32
    %115 = vector.broadcast %cst_77 : f32 to vector<8x512xf32>
    %116 = arith.subf %112, %115 : vector<8x512xf32>
    %c0_78 = arith.constant 0 : index
    %c128_79 = arith.constant 128 : index
    %117 = vector.load %arg9[%c0_78, %c128_79] : memref<8x768xf32, #tpu.memory_space<vmem>>, vector<8x512xf32>
    tpu.vector_store %arg9[%c0_78, %c128_79], %116 {strides = array<i32>} : memref<8x768xf32, #tpu.memory_space<vmem>>, vector<8x512xf32>,
    %cst_80 = arith.constant 0.000000e+00 : f32
    %118 = vector.broadcast %cst_80 : f32 to vector<8x512xf32>
    %c0_81 = arith.constant 0 : index
    %c111_82 = arith.constant 111 : index
    %119 = vector.load %arg9[%c0_81, %c111_82] : memref<8x768xf32, #tpu.memory_space<vmem>>, vector<8x512xf32>
    %c0_83 = arith.constant 0 : index
    %c0_84 = arith.constant 0 : index
    %120 = vector.load %arg2[%c0_83, %c0_84] : memref<9x512xf32, #tpu.memory_space<vmem>>, vector<1x512xf32>
    %121 = vector.broadcast %120 : vector<1x512xf32> to vector<8x512xf32>
    %122 = arith.mulf %119, %121 : vector<8x512xf32>
    %c0_85 = arith.constant 0 : index
    %c0_86 = arith.constant 0 : index
    %c0_87 = arith.constant 0 : index
    %123 = vector.load %arg5[%c0_85, %c0_86, %c0_87] : memref<9x8x8xbf16, #tpu.memory_space<vmem>>, vector<1x8x8xbf16>
    %124 = vector.shape_cast %123 : vector<1x8x8xbf16> to vector<8x8xbf16>
    %125 = arith.truncf %122 : vector<8x512xf32> to vector<8x512xbf16>
    %cst_88 = arith.constant dense<0.000000e+00> : vector<8x512xf32>
    %126 = tpu.matmul %124, %125, %cst_88 {dimension_numbers = #tpu.dot_dimension_numbers<[1], [0], [0], [1], [0, 0, 1, 1], [], []>} : vector<8x8xbf16>, vector<8x512xbf16>, vector<8x512xf32> -> vector<8x512xf32>
    %127 = arith.addf %118, %126 : vector<8x512xf32>
    %c0_89 = arith.constant 0 : index
    %c112_90 = arith.constant 112 : index
    %128 = vector.load %arg9[%c0_89, %c112_90] : memref<8x768xf32, #tpu.memory_space<vmem>>, vector<8x512xf32>
    %c1_91 = arith.constant 1 : index
    %c0_92 = arith.constant 0 : index
    %129 = vector.load %arg2[%c1_91, %c0_92] : memref<9x512xf32, #tpu.memory_space<vmem>>, vector<1x512xf32>
    %130 = vector.broadcast %129 : vector<1x512xf32> to vector<8x512xf32>
    %131 = arith.mulf %128, %130 : vector<8x512xf32>
    %c1_93 = arith.constant 1 : index
    %c0_94 = arith.constant 0 : index
    %c0_95 = arith.constant 0 : index
    %132 = vector.load %arg5[%c1_93, %c0_94, %c0_95] : memref<9x8x8xbf16, #tpu.memory_space<vmem>>, vector<1x8x8xbf16>
    %133 = vector.shape_cast %132 : vector<1x8x8xbf16> to vector<8x8xbf16>
    %134 = arith.truncf %131 : vector<8x512xf32> to vector<8x512xbf16>
    %cst_96 = arith.constant dense<0.000000e+00> : vector<8x512xf32>
    %135 = tpu.matmul %133, %134, %cst_96 {dimension_numbers = #tpu.dot_dimension_numbers<[1], [0], [0], [1], [0, 0, 1, 1], [], []>} : vector<8x8xbf16>, vector<8x512xbf16>, vector<8x512xf32> -> vector<8x512xf32>
    %136 = arith.addf %127, %135 : vector<8x512xf32>
    %c0_97 = arith.constant 0 : index
    %c113_98 = arith.constant 113 : index
    %137 = vector.load %arg9[%c0_97, %c113_98] : memref<8x768xf32, #tpu.memory_space<vmem>>, vector<8x512xf32>
    %c2_99 = arith.constant 2 : index
    %c0_100 = arith.constant 0 : index
    %138 = vector.load %arg2[%c2_99, %c0_100] : memref<9x512xf32, #tpu.memory_space<vmem>>, vector<1x512xf32>
    %139 = vector.broadcast %138 : vector<1x512xf32> to vector<8x512xf32>
    %140 = arith.mulf %137, %139 : vector<8x512xf32>
    %c2_101 = arith.constant 2 : index
    %c0_102 = arith.constant 0 : index
    %c0_103 = arith.constant 0 : index
    %141 = vector.load %arg5[%c2_101, %c0_102, %c0_103] : memref<9x8x8xbf16, #tpu.memory_space<vmem>>, vector<1x8x8xbf16>
    %142 = vector.shape_cast %141 : vector<1x8x8xbf16> to vector<8x8xbf16>
    %143 = arith.truncf %140 : vector<8x512xf32> to vector<8x512xbf16>
    %cst_104 = arith.constant dense<0.000000e+00> : vector<8x512xf32>
    %144 = tpu.matmul %142, %143, %cst_104 {dimension_numbers = #tpu.dot_dimension_numbers<[1], [0], [0], [1], [0, 0, 1, 1], [], []>} : vector<8x8xbf16>, vector<8x512xbf16>, vector<8x512xf32> -> vector<8x512xf32>
    %145 = arith.addf %136, %144 : vector<8x512xf32>
    %c0_105 = arith.constant 0 : index
    %c127_106 = arith.constant 127 : index
    %146 = vector.load %arg9[%c0_105, %c127_106] : memref<8x768xf32, #tpu.memory_space<vmem>>, vector<8x512xf32>
    %c3_107 = arith.constant 3 : index
    %c0_108 = arith.constant 0 : index
    %147 = vector.load %arg2[%c3_107, %c0_108] : memref<9x512xf32, #tpu.memory_space<vmem>>, vector<1x512xf32>
    %148 = vector.broadcast %147 : vector<1x512xf32> to vector<8x512xf32>
    %149 = arith.mulf %146, %148 : vector<8x512xf32>
    %c3_109 = arith.constant 3 : index
    %c0_110 = arith.constant 0 : index
    %c0_111 = arith.constant 0 : index
    %150 = vector.load %arg5[%c3_109, %c0_110, %c0_111] : memref<9x8x8xbf16, #tpu.memory_space<vmem>>, vector<1x8x8xbf16>
    %151 = vector.shape_cast %150 : vector<1x8x8xbf16> to vector<8x8xbf16>
    %152 = arith.truncf %149 : vector<8x512xf32> to vector<8x512xbf16>
    %cst_112 = arith.constant dense<0.000000e+00> : vector<8x512xf32>
    %153 = tpu.matmul %151, %152, %cst_112 {dimension_numbers = #tpu.dot_dimension_numbers<[1], [0], [0], [1], [0, 0, 1, 1], [], []>} : vector<8x8xbf16>, vector<8x512xbf16>, vector<8x512xf32> -> vector<8x512xf32>
    %154 = arith.addf %145, %153 : vector<8x512xf32>
    %c0_113 = arith.constant 0 : index
    %c128_114 = arith.constant 128 : index
    %155 = vector.load %arg9[%c0_113, %c128_114] : memref<8x768xf32, #tpu.memory_space<vmem>>, vector<8x512xf32>
    %c4_115 = arith.constant 4 : index
    %c0_116 = arith.constant 0 : index
    %156 = vector.load %arg2[%c4_115, %c0_116] : memref<9x512xf32, #tpu.memory_space<vmem>>, vector<1x512xf32>
    %157 = vector.broadcast %156 : vector<1x512xf32> to vector<8x512xf32>
    %158 = arith.mulf %155, %157 : vector<8x512xf32>
    %c4_117 = arith.constant 4 : index
    %c0_118 = arith.constant 0 : index
    %c0_119 = arith.constant 0 : index
    %159 = vector.load %arg5[%c4_117, %c0_118, %c0_119] : memref<9x8x8xbf16, #tpu.memory_space<vmem>>, vector<1x8x8xbf16>
    %160 = vector.shape_cast %159 : vector<1x8x8xbf16> to vector<8x8xbf16>
    %161 = arith.truncf %158 : vector<8x512xf32> to vector<8x512xbf16>
    %cst_120 = arith.constant dense<0.000000e+00> : vector<8x512xf32>
    %162 = tpu.matmul %160, %161, %cst_120 {dimension_numbers = #tpu.dot_dimension_numbers<[1], [0], [0], [1], [0, 0, 1, 1], [], []>} : vector<8x8xbf16>, vector<8x512xbf16>, vector<8x512xf32> -> vector<8x512xf32>
    %163 = arith.addf %154, %162 : vector<8x512xf32>
    %c0_121 = arith.constant 0 : index
    %c129_122 = arith.constant 129 : index
    %164 = vector.load %arg9[%c0_121, %c129_122] : memref<8x768xf32, #tpu.memory_space<vmem>>, vector<8x512xf32>
    %c5_123 = arith.constant 5 : index
    %c0_124 = arith.constant 0 : index
    %165 = vector.load %arg2[%c5_123, %c0_124] : memref<9x512xf32, #tpu.memory_space<vmem>>, vector<1x512xf32>
    %166 = vector.broadcast %165 : vector<1x512xf32> to vector<8x512xf32>
    %167 = arith.mulf %164, %166 : vector<8x512xf32>
    %c5_125 = arith.constant 5 : index
    %c0_126 = arith.constant 0 : index
    %c0_127 = arith.constant 0 : index
    %168 = vector.load %arg5[%c5_125, %c0_126, %c0_127] : memref<9x8x8xbf16, #tpu.memory_space<vmem>>, vector<1x8x8xbf16>
    %169 = vector.shape_cast %168 : vector<1x8x8xbf16> to vector<8x8xbf16>
    %170 = arith.truncf %167 : vector<8x512xf32> to vector<8x512xbf16>
    %cst_128 = arith.constant dense<0.000000e+00> : vector<8x512xf32>
    %171 = tpu.matmul %169, %170, %cst_128 {dimension_numbers = #tpu.dot_dimension_numbers<[1], [0], [0], [1], [0, 0, 1, 1], [], []>} : vector<8x8xbf16>, vector<8x512xbf16>, vector<8x512xf32> -> vector<8x512xf32>
    %172 = arith.addf %163, %171 : vector<8x512xf32>
    %c0_129 = arith.constant 0 : index
    %c143_130 = arith.constant 143 : index
    %173 = vector.load %arg9[%c0_129, %c143_130] : memref<8x768xf32, #tpu.memory_space<vmem>>, vector<8x512xf32>
    %c6_131 = arith.constant 6 : index
    %c0_132 = arith.constant 0 : index
    %174 = vector.load %arg2[%c6_131, %c0_132] : memref<9x512xf32, #tpu.memory_space<vmem>>, vector<1x512xf32>
    %175 = vector.broadcast %174 : vector<1x512xf32> to vector<8x512xf32>
    %176 = arith.mulf %173, %175 : vector<8x512xf32>
    %c6_133 = arith.constant 6 : index
    %c0_134 = arith.constant 0 : index
    %c0_135 = arith.constant 0 : index
    %177 = vector.load %arg5[%c6_133, %c0_134, %c0_135] : memref<9x8x8xbf16, #tpu.memory_space<vmem>>, vector<1x8x8xbf16>
    %178 = vector.shape_cast %177 : vector<1x8x8xbf16> to vector<8x8xbf16>
    %179 = arith.truncf %176 : vector<8x512xf32> to vector<8x512xbf16>
    %cst_136 = arith.constant dense<0.000000e+00> : vector<8x512xf32>
    %180 = tpu.matmul %178, %179, %cst_136 {dimension_numbers = #tpu.dot_dimension_numbers<[1], [0], [0], [1], [0, 0, 1, 1], [], []>} : vector<8x8xbf16>, vector<8x512xbf16>, vector<8x512xf32> -> vector<8x512xf32>
    %181 = arith.addf %172, %180 : vector<8x512xf32>
    %c0_137 = arith.constant 0 : index
    %c144_138 = arith.constant 144 : index
    %182 = vector.load %arg9[%c0_137, %c144_138] : memref<8x768xf32, #tpu.memory_space<vmem>>, vector<8x512xf32>
    %c7_139 = arith.constant 7 : index
    %c0_140 = arith.constant 0 : index
    %183 = vector.load %arg2[%c7_139, %c0_140] : memref<9x512xf32, #tpu.memory_space<vmem>>, vector<1x512xf32>
    %184 = vector.broadcast %183 : vector<1x512xf32> to vector<8x512xf32>
    %185 = arith.mulf %182, %184 : vector<8x512xf32>
    %c7_141 = arith.constant 7 : index
    %c0_142 = arith.constant 0 : index
    %c0_143 = arith.constant 0 : index
    %186 = vector.load %arg5[%c7_141, %c0_142, %c0_143] : memref<9x8x8xbf16, #tpu.memory_space<vmem>>, vector<1x8x8xbf16>
    %187 = vector.shape_cast %186 : vector<1x8x8xbf16> to vector<8x8xbf16>
    %188 = arith.truncf %185 : vector<8x512xf32> to vector<8x512xbf16>
    %cst_144 = arith.constant dense<0.000000e+00> : vector<8x512xf32>
    %189 = tpu.matmul %187, %188, %cst_144 {dimension_numbers = #tpu.dot_dimension_numbers<[1], [0], [0], [1], [0, 0, 1, 1], [], []>} : vector<8x8xbf16>, vector<8x512xbf16>, vector<8x512xf32> -> vector<8x512xf32>
    %190 = arith.addf %181, %189 : vector<8x512xf32>
    %c0_145 = arith.constant 0 : index
    %c145_146 = arith.constant 145 : index
    %191 = vector.load %arg9[%c0_145, %c145_146] : memref<8x768xf32, #tpu.memory_space<vmem>>, vector<8x512xf32>
    %c8_147 = arith.constant 8 : index
    %c0_148 = arith.constant 0 : index
    %192 = vector.load %arg2[%c8_147, %c0_148] : memref<9x512xf32, #tpu.memory_space<vmem>>, vector<1x512xf32>
    %193 = vector.broadcast %192 : vector<1x512xf32> to vector<8x512xf32>
    %194 = arith.mulf %191, %193 : vector<8x512xf32>
    %c8_149 = arith.constant 8 : index
    %c0_150 = arith.constant 0 : index
    %c0_151 = arith.constant 0 : index
    %195 = vector.load %arg5[%c8_149, %c0_150, %c0_151] : memref<9x8x8xbf16, #tpu.memory_space<vmem>>, vector<1x8x8xbf16>
    %196 = vector.shape_cast %195 : vector<1x8x8xbf16> to vector<8x8xbf16>
    %197 = arith.truncf %194 : vector<8x512xf32> to vector<8x512xbf16>
    %cst_152 = arith.constant dense<0.000000e+00> : vector<8x512xf32>
    %198 = tpu.matmul %196, %197, %cst_152 {dimension_numbers = #tpu.dot_dimension_numbers<[1], [0], [0], [1], [0, 0, 1, 1], [], []>} : vector<8x8xbf16>, vector<8x512xbf16>, vector<8x512xf32> -> vector<8x512xf32>
    %199 = arith.addf %190, %198 : vector<8x512xf32>
    %cst_153 = arith.constant 2.70624208E-4 : f32
    %200 = vector.broadcast %cst_153 : f32 to vector<8x512xf32>
    %201 = arith.mulf %199, %200 : vector<8x512xf32>
    %c0_154 = arith.constant 0 : index
    %c0_155 = arith.constant 0 : index
    %202 = vector.load %arg6[%c0_154, %c0_155] : memref<8x1xf32, #tpu.memory_space<vmem>>, vector<8x1xf32>
    %203 = vector.broadcast %202 : vector<8x1xf32> to vector<8x512xf32>
    %204 = arith.addf %201, %203 : vector<8x512xf32>
    %cst_156 = arith.constant 0.000000e+00 : f32
    %205 = vector.broadcast %cst_156 : f32 to vector<8x512xf32>
    %206 = arith.maximumf %204, %205 : vector<8x512xf32>
    %cst_157 = arith.constant 2.000000e+01 : f32
    %207 = vector.broadcast %cst_157 : f32 to vector<8x512xf32>
    %208 = arith.mulf %206, %207 : vector<8x512xf32>
    %209 = math.roundeven %208 : vector<8x512xf32>
    %cst_158 = arith.constant 0.000000e+00 : f32
    %210 = vector.broadcast %cst_158 : f32 to vector<8x512xf32>
    %211 = arith.addf %209, %210 : vector<8x512xf32>
    %cst_159 = arith.constant 0.000000e+00 : f32
    %cst_160 = arith.constant 2.550000e+02 : f32
    %212 = vector.broadcast %cst_159 : f32 to vector<8x512xf32>
    %213 = arith.maximumf %212, %211 : vector<8x512xf32>
    %214 = vector.broadcast %cst_160 : f32 to vector<8x512xf32>
    %215 = arith.minimumf %214, %213 : vector<8x512xf32>
    %cst_161 = arith.constant 0.000000e+00 : f32
    %216 = vector.broadcast %cst_161 : f32 to vector<8x512xf32>
    %217 = arith.subf %215, %216 : vector<8x512xf32>
    %cst_162 = arith.constant 5.000000e-02 : f32
    %218 = vector.broadcast %cst_162 : f32 to vector<8x512xf32>
    %219 = arith.mulf %217, %218 : vector<8x512xf32>
    %c0_163 = arith.constant 0 : index
    %c0_164 = arith.constant 0 : index
    %220 = vector.load %arg7[%c0_163, %c0_164] : memref<8x512xf32, #tpu.memory_space<vmem>>, vector<8x512xf32>
    tpu.vector_store %arg7[%c0_163, %c0_164], %219 {strides = array<i32>} : memref<8x512xf32, #tpu.memory_space<vmem>>, vector<8x512xf32>,
    return
  }
  func.func @transform_0(%arg0: i32) -> (i32, i32) {
    %c0_i32 = arith.constant 0 : i32
    %c0_i32_0 = arith.constant 0 : i32
    %c0_i32_1 = arith.constant 0 : i32
    return %c0_i32, %c0_i32_0 : i32, i32
  }
  func.func @transform_1(%arg0: i32) -> (i32, i32) {
    %c0_i32 = arith.constant 0 : i32
    %c0_i32_0 = arith.constant 0 : i32
    %c0_i32_1 = arith.constant 0 : i32
    return %c0_i32, %c0_i32_0 : i32, i32
  }
  func.func @transform_2(%arg0: i32) -> (i32, i32, i32) {
    %c0_i32 = arith.constant 0 : i32
    %c0_i32_0 = arith.constant 0 : i32
    %c0_i32_1 = arith.constant 0 : i32
    %c0_i32_2 = arith.constant 0 : i32
    return %c0_i32, %c0_i32_0, %c0_i32_1 : i32, i32, i32
  }
  func.func @transform_3(%arg0: i32) -> (i32, i32) {
    %c0_i32 = arith.constant 0 : i32
    %c0_i32_0 = arith.constant 0 : i32
    %c0_i32_1 = arith.constant 0 : i32
    return %c0_i32, %c0_i32_0 : i32, i32
  }
  func.func @transform_4(%arg0: i32) -> (i32, i32, i32) {
    %c0_i32 = arith.constant 0 : i32
    %c0_i32_0 = arith.constant 0 : i32
    %c0_i32_1 = arith.constant 0 : i32
    %c0_i32_2 = arith.constant 0 : i32
    return %c0_i32, %c0_i32_0, %c0_i32_1 : i32, i32, i32
  }
  func.func @transform_5(%arg0: i32) -> (i32, i32) {
    %c0_i32 = arith.constant 0 : i32
    %c0_i32_0 = arith.constant 0 : i32
    %c0_i32_1 = arith.constant 0 : i32
    return %c0_i32, %c0_i32_0 : i32, i32
  }
  func.func @transform_6(%arg0: i32) -> (i32, i32) {
    %c0_i32 = arith.constant 0 : i32
    %c0_i32_0 = arith.constant 0 : i32
    %c0_i32_1 = arith.constant 0 : i32
    return %c0_i32, %c0_i32_0 : i32, i32
  }
}

</mosaic_0001>

<bundles_post_ra>
// kernel: _lambda_.1
= control target key start
LH: loop header
LB: loop body
LE: loop exit
PB: predicated region body
PF: predicated region fallthrough
CT: control target
= control target key end

     0   :  { %v48_v0 = vlaneseq  ;;  %v3323_v1 = vmov 0.0   ;;  %s3324_s27 = smov 112   ;;  %s3325_s28 = smov 111   ;;  %vm72_vm2 = vcmask 908288   ;;  %vm122_vm3 = vcmask 916480   ;;  %s4091_s1 = inlined_call_operand.vmem [shape: f32[9,512], index: 1, kind: input, shape index: {}]   ;;  %s4092_s0 = inlined_call_operand.vmem [shape: f32[4,512], index: 0, kind: input, shape index: {}]   ;;  %s4093_s3 = inlined_call_operand.vmem [shape: f32[8,1], index: 3, kind: input, shape index: {}]   ;;  %s4094_s2 = inlined_call_operand.vmem [shape: bf16[9,8,4], index: 2, kind: input, shape index: {}]   ;;  %s4095_s5 = inlined_call_operand.vmem [shape: f32[8,1], index: 5, kind: input, shape index: {}]   ;;  %s4096_s4 = inlined_call_operand.vmem [shape: bf16[9,8,8], index: 4, kind: input, shape index: {}]   ;;  %s4097_s6 = inlined_call_operand.vmem [shape: f32[8,512], index: 6, kind: output, shape index: {}]  }
   0x1   :  { %36 = vst [vmem:[#allocation2] sm:$0xff] %v3323_v1  ;;  %37 = vst [vmem:[#allocation2 + $0x8] sm:$0xff] %v3323_v1  ;;  %v3128_v3 = vld [vmem:[%s4091_s1 + $0x1] ss:$8 sm:$0xf]  ;;  %s3326_s15 = smov 113  }
   0x2   :  { %38 = vst [vmem:[#allocation2 + $0x10] sm:$0xff] %v3323_v1  ;;  %v49_v2 = vshrl.u32 %v48_v0, 7  ;;  %v46_v4 = vld [vmem:[%s4091_s1] ss:$8 sm:$0xf]  ;;  %s3327_s17 = smov 127  }
   0x3   :  { %v3138_v13 = vld [vmem:[%s4091_s1 + $0x2] ss:$8 sm:$0xf]  ;;  %v3144_v26 = vld [vmem:[%s4091_s1 + $0x3] ss:$8 sm:$0xf] }
   0x4   :  { %v3374_v5 = vsub.s32 0, %v49_v2  ;;  %v3376_v6 = vsub.s32 1, %v49_v2  ;;  %v3378_v7 = vsub.s32 2, %v49_v2  ;;  %v3380_v8 = vsub.s32 3, %v49_v2  ;;  %v24_v27 = vld [vmem:[%s4092_s0] sm:$0xff]  ;;  %v25_v36 = vld [vmem:[%s4092_s0 + $0x8] sm:$0xff] }
   0x5   :  { %v3156_v34 = vld [vmem:[%s4091_s1 + $0x5] ss:$8 sm:$0xf]  ;;  %v26_v35 = vmul.f32 63.75, %v24_v27  ;;  %v27_v46 = vmul.f32 63.75, %v25_v36  ;;  %s3328_s20 = smov 1  }
   0x6   :  { %v101_v9 = vrot.slane %v3128_v3, %v3374_v5  ;;  %v105_v10 = vrot.slane %v3128_v3, %v3376_v6  ;;  %v51_v11 = vrot.slane %v46_v4, %v3374_v5  ;;  %v55_v12 = vrot.slane %v46_v4, %v3376_v6  ;;  %v3162_v40 = vld [vmem:[%s4091_s1 + $0x6] ss:$8 sm:$0xf]  ;;  %v3168_v53 = vld [vmem:[%s4091_s1 + $0x7] ss:$8 sm:$0xf] }
   0x7   :  { %v109_v14 = vrot.slane %v3128_v3, %v3378_v7  ;;  %v113_v15 = vrot.slane %v3128_v3, %v3380_v8  ;;  %v59_v16 = vrot.slane %v46_v4, %v3378_v7  ;;  %v63_v17 = vrot.slane %v46_v4, %v3380_v8  ;;  %v3174_v3 = vld [vmem:[%s4091_s1 + $0x20] ss:$8 sm:$0xf]  ;;  %s3329_s21 = smov 15   ;;  %s3330_s22 = smov 16  }
   0x8   :  { %v114_v18 = vcombine.low %v101_v9, %v105_v10  ;;  %v64_v19 = vcombine.low %v51_v11, %v55_v12  ;;  %v390_v21 = vrot.slane %v3138_v13, %v3374_v5  ;;  %v394_v22 = vrot.slane %v3138_v13, %v3376_v6  ;;  %s3331_s23 = smov 17  }
   0x9   :  { %v115_v20 = vcombine.low %v109_v14, %v113_v15  ;;  %v65_v23 = vcombine.low %v59_v16, %v63_v17  ;;  %v398_v24 = vrot.slane %v3138_v13, %v3378_v7  ;;  %v402_v25 = vrot.slane %v3138_v13, %v3380_v8 }
   0xa   :  { %116 = vrot.lane.b32.xlu0 %v114_v18, %s3324_s27  ;;  %66 = vrot.lane.b32.xlu1 %v64_v19, %s3325_s28  ;;  %v403_v28 = vcombine.low %v390_v21, %v394_v22  ;;  %v564_v29 = vrot.slane %v3144_v26, %v3374_v5  ;;  %v568_v30 = vrot.slane %v3144_v26, %v3376_v6  ;;  %v3234_v44 = vcvt.f32.s32 %v26_v35 }
   0xb   :  { %v404_v31 = vcombine.low %v398_v24, %v402_v25  ;;  %v572_v32 = vrot.slane %v3144_v26, %v3378_v7  ;;  %v576_v33 = vrot.slane %v3144_v26, %v3380_v8  ;;  %v878_v38 = vrot.slane %v3156_v34, %v3374_v5 }
   0xc   :  { %v577_v37 = vcombine.low %v564_v29, %v568_v30  ;;  %v882_v39 = vrot.slane %v3156_v34, %v3376_v6  ;;  %v886_v42 = vrot.slane %v3156_v34, %v3378_v7  ;;  %v890_v43 = vrot.slane %v3156_v34, %v3380_v8 }
   0xd   :  { %v578_v41 = vcombine.low %v572_v32, %v576_v33  ;;  %v3232_v45 = vand.u32 2147483647, %v26_v35  ;;  %v1052_v47 = vrot.slane %v3162_v40, %v3374_v5  ;;  %v1056_v48 = vrot.slane %v3162_v40, %v3376_v6 }
   0xe   :  { %118 = vrot.lane.b32.xlu0 %v115_v20, %s3324_s27  ;;  %68 = vrot.lane.b32.xlu1 %v65_v23, %s3325_s28  ;;  %v3235_v49 = vcvt.s32.f32 %v3234_v44  ;;  %v3237_v50 = vand.u32 2147483648, %v26_v35  ;;  %v891_v51 = vcombine.low %v878_v38, %v882_v39  ;;  %v1060_v52 = vrot.slane %v3162_v40, %v3378_v7 }
   0xf   :  { %v3242_v54 = vcvt.f32.s32 %v27_v46  ;;  %v892_v55 = vcombine.low %v886_v42, %v890_v43  ;;  %v1064_v56 = vrot.slane %v3162_v40, %v3380_v8  ;;  %v3240_v58 = vand.u32 2147483647, %v27_v46 }
  0x10   :  { %v3236_v57 = vand.u32 2147483647, %v3235_v49  ;;  %vm3435_vm0 = vcmp.lt.f32.partialorder %v3232_v45, 8388608.0  ;;  %v3245_v61 = vand.u32 2147483648, %v27_v46  ;;  %v1065_v62 = vcombine.low %v1052_v47, %v1056_v48 }
  0x11   :  { %v3243_v60 = vcvt.s32.f32 %v3242_v54  ;;  %v1226_v0 = vrot.slane %v3168_v53, %v3374_v5  ;;  %v1230_v1 = vrot.slane %v3168_v53, %v3376_v6  ;;  %v1234_v2 = vrot.slane %v3168_v53, %v3378_v7 }
  0x12   :  { %405 = vrot.lane.b32.xlu0 %v403_v28, %s3326_s15  ;;  %407 = vrot.lane.b32.xlu1 %v404_v31, %s3326_s15  ;;  %v3238_v63 = vor.u32 %v3237_v50, %v3236_v57  ;;  %v1066_v9 = vcombine.low %v1060_v52, %v1064_v56  ;;  %v1238_v10 = vrot.slane %v3168_v53, %v3380_v8  ;;  %vm3241_vm1 = vcmp.lt.f32.partialorder %v3240_v58, 8388608.0 }
  0x13   :  { %v3244_v4 = vand.u32 2147483647, %v3243_v60  ;;  %v1400_v14 = vrot.slane %v3174_v3, %v3374_v5  ;;  %v1239_v15 = vcombine.low %v1226_v0, %v1230_v1  ;;  %v1404_v16 = vrot.slane %v3174_v3, %v3376_v6 }
  0x14   :  { %v3239_v11 = vsel %vm3435_vm0, %v3238_v63, %v26_v35  ;;  %v1240_v19 = vcombine.low %v1234_v2, %v1238_v10  ;;  %v1408_v20 = vrot.slane %v3174_v3, %v3378_v7  ;;  %v1412_v21 = vrot.slane %v3174_v3, %v3380_v8 }
  0x15   :  { %v30_v12 = vadd.f32 128.0, %v3239_v11  ;;  %v3246_v13 = vor.u32 %v3245_v61, %v3244_v4  ;;  %v1413_v26 = vcombine.low %v1400_v14, %v1404_v16  ;;  %vm74_vm4 = vcmask 1043456  }
  0x16   :  { %579 = vrot.lane.b32.xlu0 %v577_v37, %s3327_s17  ;;  %581 = vrot.lane.b32.xlu1 %v578_v41, %s3327_s17  ;;  %v1414_v27 = vcombine.low %v1408_v20, %v1412_v21  ;;  %v3332_v58 = vmov 0   ;;  %vm411_vm5 = vcmask 924672   ;;  %vm585_vm6 = vcmask 1039360  }
  0x17   :  { %v32_v17 = vmax.f32 %v30_v12, 0.0  ;;  %v3247_v18 = vsel %vm3241_vm1, %v3246_v13, %v27_v46  ;;  %214 = vmatprep.mubr.bf16.mxu0 %v3332_v58  ;;  %255 = vmatprep.mubr.bf16.mxu1 %v3332_v58  ;;  %vm623_vm7 = vcmask 7168   ;;  %vm449_vm8 = vcmask 121856  }
  0x18   :  { %v31_v22 = vadd.f32 128.0, %v3247_v18  ;;  %3322 = vset.pattern.permute.xlu0 %v3332_v58  ;;  %vm160_vm9 = vcmask 130048   ;;  %vm279_vm10 = vcmask 138240   ;;  %vm169_vm11 = vcmask 1041408  }
  0x19   :  { %v34_v23 = vmin.f32 %v32_v17, 255.0  ;;  %vm165_vm12 = vcmask 31744   ;;  %vm1728_vm1 = vcmask 64512  }
  0x1a   :  { %893 = vrot.lane.b32.xlu0 %v891_v51, %s3328_s20  ;;  %895 = vrot.lane.b32.xlu1 %v892_v55, %s3328_s20  ;;  %v33_v24 = vmax.f32 %v31_v22, 0.0 }
  0x1b   :  { %v3456_v25 = vadd.f32 -128.0, %v34_v23 }
  0x1c   :  { %v35_v28 = vmin.f32 %v33_v24, 255.0 }
  0x1d   :  { %41 = vst [vmem:[#allocation2 + $0x4] sm:$0xff] %v3456_v25 }
  0x1e   :  { %1067 = vrot.lane.b32.xlu0 %v1065_v62, %s3329_s21  ;;  %1069 = vrot.lane.b32.xlu1 %v1066_v9, %s3329_s21  ;;  %v3461_v29 = vadd.f32 -128.0, %v35_v28 }
  0x20   :  { %42 = vst [vmem:[#allocation2 + $0xc] sm:$0xff] %v3461_v29 }
  0x22   :  { %1241 = vrot.lane.b32.xlu0 %v1239_v15, %s3330_s22  ;;  %1243 = vrot.lane.b32.xlu1 %v1240_v19, %s3330_s22 }
  0x24   :  { %v43_v32 = vld [vmem:[#allocation2] sm:$0xff] }
  0x26   :  { %1415 = vrot.lane.b32.xlu0 %v1413_v26, %s3331_s23  ;;  %1417 = vrot.lane.b32.xlu1 %v1414_v27, %s3331_s23 }
  0x27   :  { %v45_v40 = vld [vmem:[#allocation2 + $0x10] sm:$0xf]  ;;  %v3468_v43 = vld [vmem:[#allocation2 + $0x8] sm:$0xff] }
  0x7c   :  { %v117_v30 = vpop.permute.xlu0 %116  ;;  %v67_v31 = vpop.permute.xlu1 %66 }
  0x7d   :  { %v120_v33 = vrot.slane %v117_v30, 4  ;;  %v70_v34 = vrot.slane %v67_v31, 4 }
  0x7f   :  { %v73_v35 = vsel %vm72_vm2, %v70_v34, %v67_v31  ;;  %v123_v36 = vsel %vm122_vm3, %v120_v33, %v117_v30 }
  0x80   :  { %v80_v37 = vmul.f32 %v73_v35, %v43_v32  ;;  %v119_v38 = vpop.permute.xlu0 %118  ;;  %v69_v39 = vpop.permute.xlu1 %68  ;;  %v129_v45 = vmul.f32 %v123_v36, %v43_v32 }
  0x81   :  { %v121_v41 = vrot.slane %v119_v38, 4  ;;  %v71_v42 = vrot.slane %v69_v39, 4 }
  0x82   :  { %v90_v44 = vpack.c.bf16 %v80_v37, %v80_v37  ;;  %v136_v56 = vcombine.high %v129_v45, %v129_v45  ;;  %v140_v59 = vpack.c.bf16 %v129_v45, %v129_v45  ;;  %v86_v3 = vcombine.high %v80_v37, %v80_v37 }
  0x83   :  { %v124_v46 = vsel %vm74_vm4, %v120_v33, %v121_v41  ;;  %v75_v47 = vsel %vm74_vm4, %v70_v34, %v71_v42  ;;  %v131_v48 = vmul.f32 %v121_v41, %v45_v40  ;;  %v82_v11 = vmul.f32 %v71_v42, %v45_v40  ;;  %v383_v33 = vld [vmem:[#allocation2 + $0x10] sm:$0xf] }
  0x84   :  { %v125_v49 = vsel %vm122_vm3, %v124_v46, %v119_v38  ;;  %v76_v50 = vsel %vm72_vm2, %v75_v47, %v69_v39  ;;  %269 = vrot.lane.b32.xlu1 %v90_v44, %s3331_s23  ;;  %v406_v53 = vpop.permute.xlu0 %405  ;;  %v408_v60 = vpop.permute.xlu1 %407  ;;  %v141_v61 = vpack.c.bf16 %v136_v56, %v136_v56  ;;  %v91_v13 = vpack.c.bf16 %v86_v3, %v86_v3  ;;  %v557_v42 = vld [vmem:[#allocation2 + $0x10] sm:$0xf] }
  0x85   :  { %v81_v51 = vmul.f32 %v76_v50, %v3468_v43  ;;  %v144_v52 = vpack.c.bf16 %v131_v48, %v131_v48  ;;  %v130_v54 = vmul.f32 %v125_v49, %v3468_v43  ;;  %v409_v57 = vrot.slane %v406_v53, 4 }
  0x86   :  { %v410_v1 = vrot.slane %v408_v60, 4  ;;  %v94_v16 = vpack.c.bf16 %v82_v11, %v82_v11 }
  0x87   :  { %158 = vrot.lane.b32.xlu0 %v144_v52, %s3330_s22  ;;  %v92_v55 = vpack.c.bf16 %v81_v51, %v81_v51  ;;  %v137_v62 = vcombine.high %v130_v54, %v130_v54  ;;  %v412_v0 = vsel %vm411_vm5, %v409_v57, %v406_v53  ;;  %v142_v2 = vpack.c.bf16 %v130_v54, %v130_v54 }
  0x88   :  { %v580_v63 = vpop.permute.xlu0 %579  ;;  %v418_v9 = vmul.f32 %v412_v0, %v43_v32  ;;  %v413_v12 = vsel %vm74_vm4, %v409_v57, %v410_v1  ;;  %v582_v15 = vpop.permute.xlu1 %581  ;;  %v87_v22 = vcombine.high %v81_v51, %v81_v51  ;;  %v420_v37 = vmul.f32 %v410_v1, %v383_v33 }
  0x89   :  { %273 = vrot.lane.b32.xlu1 %v92_v55, %s3331_s23  ;;  %v583_v4 = vrot.slane %v580_v63, 4  ;;  %v143_v10 = vpack.c.bf16 %v137_v62, %v137_v62  ;;  %v414_v18 = vsel %vm411_vm5, %v413_v12, %v408_v60  ;;  %v584_v20 = vrot.slane %v582_v15, 4 }
  0x8a   :  { %v425_v17 = vcombine.high %v418_v9, %v418_v9  ;;  %v429_v21 = vpack.c.bf16 %v418_v9, %v418_v9  ;;  %v419_v23 = vmul.f32 %v414_v18, %v3468_v43  ;;  %v93_v28 = vpack.c.bf16 %v87_v22, %v87_v22 }
  0x8b   :  { %150 = vrot.lane.b32.xlu0 %v140_v59, %s3330_s22  ;;  %v586_v14 = vsel %vm585_vm6, %v583_v4, %v580_v63  ;;  %v587_v27 = vsel %vm74_vm4, %v583_v4, %v584_v20  ;;  %v433_v46 = vpack.c.bf16 %v420_v37, %v420_v37  ;;  %v594_v51 = vmul.f32 %v584_v20, %v557_v42 }
  0x8c   :  { %v592_v19 = vmul.f32 %v586_v14, %v43_v32  ;;  %v430_v24 = vpack.c.bf16 %v425_v17, %v425_v17  ;;  %v894_v26 = vpop.permute.xlu0 %893  ;;  %v426_v32 = vcombine.high %v419_v23, %v419_v23  ;;  %v588_v34 = vsel %vm585_vm6, %v587_v27, %v582_v15  ;;  %v896_v35 = vpop.permute.xlu1 %895 }
  0x8d   :  { %152 = vrot.lane.b32.xlu1 %v141_v61, %s3330_s22  ;;  %v897_v31 = vrot.slane %v894_v26, 4  ;;  %v431_v36 = vpack.c.bf16 %v419_v23, %v419_v23  ;;  %v593_v39 = vmul.f32 %v588_v34, %v3468_v43  ;;  %v898_v49 = vrot.slane %v896_v35, 4 }
  0x8e   :  { %v603_v30 = vpack.c.bf16 %v592_v19, %v592_v19  ;;  %v432_v40 = vpack.c.bf16 %v426_v32, %v426_v32  ;;  %v599_v47 = vcombine.high %v592_v19, %v592_v19  ;;  %v607_v57 = vpack.c.bf16 %v594_v51, %v594_v51  ;;  %v1045_v19 = vld [vmem:[#allocation2 + $0x14] sm:$0xf] }
  0x8f   :  { %154 = vrot.lane.b32.xlu0 %v142_v2, %s3330_s22  ;;  %v900_v38 = vsel %vm623_vm7, %v897_v31, %v894_v26  ;;  %v605_v50 = vpack.c.bf16 %v593_v39, %v593_v39  ;;  %v600_v53 = vcombine.high %v593_v39, %v593_v39  ;;  %v901_v56 = vsel %vm74_vm4, %v897_v31, %v898_v49 }
  0x90   :  { %v1068_v41 = vpop.permute.xlu0 %1067  ;;  %v1070_v44 = vpop.permute.xlu1 %1069  ;;  %v906_v45 = vmul.f32 %v3456_v25, %v900_v38  ;;  %v604_v52 = vpack.c.bf16 %v599_v47, %v599_v47  ;;  %v902_v63 = vsel %vm623_vm7, %v901_v56, %v896_v35 }
  0x91   :  { %156 = vrot.lane.b32.xlu1 %v143_v10, %s3330_s22  ;;  %v1071_v48 = vrot.slane %v1068_v41, 4  ;;  %v1072_v43 = vrot.slane %v1070_v44, 4  ;;  %v606_v61 = vpack.c.bf16 %v600_v53, %v600_v53  ;;  %v907_v1 = vmul.f32 %v3461_v29, %v902_v63  ;;  %v871_v10 = vld [vmem:[#allocation2 + $0x14] sm:$0xf] }
  0x92   :  { %v913_v54 = vcombine.high %v906_v45, %v906_v45  ;;  %v917_v3 = vpack.c.bf16 %v906_v45, %v906_v45  ;;  %v908_v14 = vmul.f32 %v898_v49, %v871_v10 }
  0x93   :  { %271 = vrot.lane.b32.xlu0 %v91_v13, %s3331_s23  ;;  %v1074_v55 = vsel %vm449_vm8, %v1071_v48, %v1068_v41  ;;  %v1075_v59 = vsel %vm74_vm4, %v1071_v48, %v1072_v43  ;;  %v919_v12 = vpack.c.bf16 %v907_v1, %v907_v1  ;;  %v1082_v27 = vmul.f32 %v1072_v43, %v1045_v19 }
  0x94   :  { %v1080_v60 = vmul.f32 %v3456_v25, %v1074_v55  ;;  %v918_v62 = vpack.c.bf16 %v913_v54, %v913_v54  ;;  %v1076_v0 = vsel %vm449_vm8, %v1075_v59, %v1070_v44  ;;  %v1242_v9 = vpop.permute.xlu0 %1241  ;;  %v1244_v15 = vpop.permute.xlu1 %1243 }
  0x95   :  { %277 = vrot.lane.b32.xlu1 %v94_v16, %s3331_s23  ;;  %v1081_v2 = vmul.f32 %v3461_v29, %v1076_v0  ;;  %v1245_v11 = vrot.slane %v1242_v9, 4  ;;  %v914_v16 = vcombine.high %v907_v1, %v907_v1  ;;  %v1246_v20 = vrot.slane %v1244_v15, 4  ;;  %v1569_v0 = vld [vmem:[%s4093_s3] sm:$0xff] }
  0x96   :  { %v1091_v4 = vpack.c.bf16 %v1080_v60, %v1080_v60  ;;  %v1087_v22 = vcombine.high %v1080_v60, %v1080_v60  ;;  %v1095_v32 = vpack.c.bf16 %v1082_v27, %v1082_v27  ;;  %v3180_v60 = vld [vmem:[%s4091_s1 + $0x1] ss:$8 sm:$0xf] }
  0x97   :  { %439 = vrot.lane.b32.xlu0 %v429_v21, %s3329_s21  ;;  %v1093_v13 = vpack.c.bf16 %v1081_v2, %v1081_v2  ;;  %v1248_v18 = vsel %vm160_vm9, %v1245_v11, %v1242_v9  ;;  %v921_v21 = vpack.c.bf16 %v908_v14, %v908_v14  ;;  %v920_v26 = vpack.c.bf16 %v914_v16, %v914_v16 }
  0x98   :  { %v1416_v17 = vpop.permute.xlu0 %1415  ;;  %v1418_v33 = vpop.permute.xlu1 %1417  ;;  %v1088_v39 = vcombine.high %v1081_v2, %v1081_v2  ;;  %v1668_v63 = vrot.slane %v3180_v60, %v3374_v5  ;;  %v1672_v1 = vrot.slane %v3180_v60, %v3376_v6  ;;  %v1676_v2 = vrot.slane %v3180_v60, %v3378_v7 }
  0x99   :  { %441 = vrot.lane.b32.xlu1 %v430_v24, %s3329_s21  ;;  %v1419_v23 = vrot.slane %v1416_v17, 4  ;;  %v1254_v24 = vmul.f32 %v3456_v25, %v1248_v18  ;;  %v1420_v37 = vrot.slane %v1418_v33, 4 }
  0x9a   :  { %v1094_v44 = vpack.c.bf16 %v1088_v39, %v1088_v39 }
  0x9b   :  { %275 = vrot.lane.b32.xlu0 %v93_v28, %s3331_s23  ;;  %v1249_v28 = vsel %vm74_vm4, %v1245_v11, %v1246_v20  ;;  %v1422_v31 = vsel %vm279_vm10, %v1419_v23, %v1416_v17  ;;  %v1261_v34 = vcombine.high %v1254_v24, %v1254_v24  ;;  %v1265_v38 = vpack.c.bf16 %v1254_v24, %v1254_v24  ;;  %v3196_v17 = vld [vmem:[%s4091_s1 + $0x3] ss:$8 sm:$0xf] }
  0x9c   :  { %v1250_v35 = vsel %vm160_vm9, %v1249_v28, %v1244_v15  ;;  %v1423_v42 = vsel %vm74_vm4, %v1419_v23, %v1420_v37  ;;  %v2113_v19 = vrot.slane %v3196_v17, %v3374_v5  ;;  %v2125_v23 = vrot.slane %v3196_v17, %v3380_v8 }
  0x9d   :  { %613 = vrot.lane.b32.xlu1 %v603_v30, %s3328_s20  ;;  %v1092_v30 = vpack.c.bf16 %v1087_v22, %v1087_v22  ;;  %v1266_v41 = vpack.c.bf16 %v1261_v34, %v1261_v34  ;;  %v1424_v48 = vsel %vm279_vm10, %v1423_v42, %v1418_v33  ;;  %v3208_v22 = vld [vmem:[%s4091_s1 + $0x5] ss:$8 sm:$0xf] }
  0x9e   :  { %v1429_v51 = vmul.f32 %v3461_v29, %v1424_v48  ;;  %v2417_v24 = vrot.slane %v3208_v22, %v3374_v5  ;;  %v2425_v28 = vrot.slane %v3208_v22, %v3378_v7  ;;  %v2429_v33 = vrot.slane %v3208_v22, %v3380_v8 }
  0x9f   :  { %443 = vrot.lane.b32.xlu0 %v431_v36, %s3329_s21  ;;  %v1428_v36 = vmul.f32 %v3456_v25, %v1422_v31 }
  0xa0   :  { %v1441_v55 = vpack.c.bf16 %v1429_v51, %v1429_v51  ;;  %v1436_v59 = vcombine.high %v1429_v51, %v1429_v51 }
  0xa1   :  { %445 = vrot.lane.b32.xlu1 %v432_v40, %s3329_s21  ;;  %v1255_v40 = vmul.f32 %v3461_v29, %v1250_v35  ;;  %v1439_v45 = vpack.c.bf16 %v1428_v36, %v1428_v36  ;;  %v1435_v54 = vcombine.high %v1428_v36, %v1428_v36 }
  0xa3   :  { %447 = vrot.lane.b32.xlu0 %v433_v46, %s3329_s21  ;;  %v1219_v46 = vld [vmem:[#allocation2 + $0x14] sm:$0xf]  ;;  %v1262_v47 = vcombine.high %v1255_v40, %v1255_v40  ;;  %v1267_v49 = vpack.c.bf16 %v1255_v40, %v1255_v40 }
  0xa5   :  { %617 = vrot.lane.b32.xlu1 %v605_v50, %s3328_s20  ;;  %v1256_v50 = vmul.f32 %v1246_v20, %v1219_v46  ;;  %v1268_v43 = vpack.c.bf16 %v1262_v47, %v1262_v47  ;;  %v2117_v20 = vrot.slane %v3196_v17, %v3376_v6 }
  0xa7   :  { %615 = vrot.lane.b32.xlu0 %v604_v52, %s3328_s20  ;;  %v1393_v52 = vld [vmem:[#allocation2 + $0x14] sm:$0xf]  ;;  %v1269_v53 = vpack.c.bf16 %v1256_v50, %v1256_v50 }
  0xa8   :  { %v1430_v56 = vmul.f32 %v1420_v37, %v1393_v52 }
  0xa9   :  { %621 = vrot.lane.b32.xlu1 %v607_v57, %s3328_s20  ;;  %v1440_v57 = vpack.c.bf16 %v1435_v54, %v1435_v54  ;;  %v3150_v54 = vld [vmem:[%s4091_s1 + $0x4] ss:$8 sm:$0xf] }
  0xab   :  { %619 = vrot.lane.b32.xlu0 %v606_v61, %s3328_s20  ;;  %v1443_v61 = vpack.c.bf16 %v1430_v56, %v1430_v56 }
  0xad   :  { %929 = vrot.lane.b32.xlu1 %v918_v62, %s3327_s17  ;;  %v1442_v62 = vpack.c.bf16 %v1436_v59, %v1436_v59 }
  0xaf   :  { %927 = vrot.lane.b32.xlu0 %v917_v3, %s3327_s17  ;;  %v1618_v3 = vld [vmem:[%s4091_s1] ss:$8 sm:$0xf] }
  0xb0   :  { %v1623_v9 = vrot.slane %v1618_v3, %v3374_v5  ;;  %v1627_v10 = vrot.slane %v1618_v3, %v3376_v6  ;;  %v1631_v11 = vrot.slane %v1618_v3, %v3378_v7 }
  0xb1   :  { %1101 = vrot.lane.b32.xlu1 %v1091_v4, %s3326_s15  ;;  %v1680_v4 = vrot.slane %v3180_v60, %v3380_v8  ;;  %v737_v60 = vrot.slane %v3150_v54, %v3374_v5 }
  0xb3   :  { %931 = vrot.lane.b32.xlu0 %v919_v12, %s3327_s17  ;;  %v3190_v12 = vld [vmem:[%s4091_s1 + $0x2] ss:$8 sm:$0xf] }
  0xb4   :  { %v1947_v14 = vrot.slane %v3190_v12, %v3374_v5  ;;  %v1951_v15 = vrot.slane %v3190_v12, %v3376_v6  ;;  %v1955_v16 = vrot.slane %v3190_v12, %v3378_v7  ;;  %v1959_v18 = vrot.slane %v3190_v12, %v3380_v8 }
  0xb5   :  { %1105 = vrot.lane.b32.xlu1 %v1093_v13, %s3326_s15  ;;  %v1635_v13 = vrot.slane %v1618_v3, %v3380_v8 }
  0xb7   :  { %935 = vrot.lane.b32.xlu0 %v921_v21, %s3327_s17  ;;  %v2121_v21 = vrot.slane %v3196_v17, %v3378_v7 }
  0xb9   :  { %933 = vrot.lane.b32.xlu1 %v920_v26, %s3327_s17  ;;  %v2421_v26 = vrot.slane %v3208_v22, %v3376_v6 }
  0xbb   :  { %1103 = vrot.lane.b32.xlu0 %v1092_v30, %s3326_s15  ;;  %v3214_v30 = vld [vmem:[%s4091_s1 + $0x6] ss:$8 sm:$0xf] }
  0xbc   :  { %v2583_v34 = vrot.slane %v3214_v30, %v3374_v5  ;;  %v2587_v36 = vrot.slane %v3214_v30, %v3376_v6 }
  0xbd   :  { %1109 = vrot.lane.b32.xlu1 %v1095_v32, %s3326_s15 }
  0xbf   :  { %1275 = vrot.lane.b32.xlu0 %v1265_v38, %s3324_s27  ;;  %v2591_v38 = vrot.slane %v3214_v30, %v3378_v7 }
  0xc1   :  { %1277 = vrot.lane.b32.xlu1 %v1266_v41, %s3324_s27  ;;  %v2595_v41 = vrot.slane %v3214_v30, %v3380_v8 }
  0xc3   :  { %1107 = vrot.lane.b32.xlu0 %v1094_v44, %s3326_s15  ;;  %v3220_v44 = vld [vmem:[%s4091_s1 + $0x7] ss:$8 sm:$0xf] }
  0xc5   :  { %1449 = vrot.lane.b32.xlu1 %v1439_v45, %s3325_s28 }
  0xc7   :  { %1279 = vrot.lane.b32.xlu0 %v1267_v49, %s3324_s27  ;;  %v3129_v49 = vld [vmem:[%s4094_s2 + $0x4] sm:$0xf] }
  0xc9   :  { %1281 = vrot.lane.b32.xlu1 %v1268_v43, %s3324_s27  ;;  %v2749_v43 = vrot.slane %v3220_v44, %v3374_v5 }
  0xcb   :  { %1283 = vrot.lane.b32.xlu0 %v1269_v53, %s3324_s27 }
  0xcd   :  { %1453 = vrot.lane.b32.xlu1 %v1441_v55, %s3325_s28  ;;  %v2753_v55 = vrot.slane %v3220_v44, %v3376_v6 }
  0xcf   :  { %1451 = vrot.lane.b32.xlu0 %v1440_v57, %s3325_s28 }
  0xd1   :  { %1457 = vrot.lane.b32.xlu1 %v1443_v61, %s3325_s28  ;;  %v741_v61 = vrot.slane %v3150_v54, %v3376_v6 }
  0xd3   :  { %1455 = vrot.lane.b32.xlu0 %v1442_v62, %s3325_s28  ;;  %v2757_v62 = vrot.slane %v3220_v44, %v3378_v7 }
  0xd5   :  { %1681 = vrot.lane.b32.xlu1 %v1668_v63, %s3324_s27  ;;  %v2761_v63 = vrot.slane %v3220_v44, %v3380_v8 }
  0xd7   :  { %1572 = vperm.xlu0 %3322, %v1569_v0  }
  0xd9   :  { %1683 = vrot.lane.b32.xlu1 %v1672_v1, %s3324_s27  ;;  %v3652_v1 = vld [vmem:[%s4091_s1 + $0x20] ss:$8 sm:$0xf] }
  0xdb   :  { %1685 = vrot.lane.b32.xlu0 %v1676_v2, %s3324_s27  ;;  %v83_v2 = vld [vmem:[%s4094_s2] sm:$0xf] }
  0xdd   :  { %1687 = vrot.lane.b32.xlu1 %v1680_v4, %s3324_s27  ;;  %v750_v4 = vcombine.low %v737_v60, %v741_v61 }
  0xdf   :  { %1636 = vrot.lane.b32.xlu0 %v1623_v9, %s3325_s28  ;;  %v745_v9 = vrot.slane %v3150_v54, %v3378_v7 }
  0xe1   :  { %1638 = vrot.lane.b32.xlu1 %v1627_v10, %s3325_s28  ;;  %v749_v10 = vrot.slane %v3150_v54, %v3380_v8 }
  0xe3   :  { %1640 = vrot.lane.b32.xlu0 %v1631_v11, %s3325_s28 }
  0xe5   :  { %1642 = vrot.lane.b32.xlu1 %v1635_v13, %s3325_s28  ;;  %v2915_v13 = vrot.slane %v3652_v1, %v3374_v5 }
  0xe7   :  { %1960 = vrot.lane.b32.xlu0 %v1947_v14, %s3326_s15 }
  0xe9   :  { %1962 = vrot.lane.b32.xlu1 %v1951_v15, %s3326_s15 }
  0xeb   :  { %1964 = vrot.lane.b32.xlu0 %v1955_v16, %s3326_s15 }
  0xed   :  { %1966 = vrot.lane.b32.xlu1 %v1959_v18, %s3326_s15  ;;  %v754_v18 = vmul.f32 %v3456_v25, %v750_v4  ;;  %v3139_v25 = vld [vmem:[%s4094_s2 + $0x8] sm:$0xf] }
  0xef   :  { %2126 = vrot.lane.b32.xlu0 %v2113_v19, %s3327_s17  ;;  %v751_v19 = vcombine.low %v745_v9, %v749_v10 }
  0xf1   :  { %2128 = vrot.lane.b32.xlu1 %v2117_v20, %s3327_s17 }
  0xf3   :  { %2130 = vrot.lane.b32.xlu0 %v2121_v21, %s3327_s17  ;;  %v2923_v21 = vrot.slane %v3652_v1, %v3378_v7 }
  0xf5   :  { %2132 = vrot.lane.b32.xlu1 %v2125_v23, %s3327_s17 }
  0xf6   :  { %v270_v27 = vpop.permute.xlu1 %269 }
  0xf7   :  { %2430 = vrot.lane.b32.xlu0 %v2417_v24, %s3328_s20 }
  0xf9   :  { %v159_v31 = vpop.permute.xlu0 %158  ;;  %2432 = vrot.lane.b32.xlu1 %v2421_v26, %s3328_s20 }
  0xfb   :  { %v274_v32 = vpop.permute.xlu1 %273  ;;  %2434 = vrot.lane.b32.xlu0 %v2425_v28, %s3328_s20  ;;  %v755_v28 = vmul.f32 %v3461_v29, %v751_v19 }
  0xfd   :  { %v151_v35 = vpop.permute.xlu0 %150  ;;  %2436 = vrot.lane.b32.xlu1 %v2429_v33, %s3328_s20 }
  0xff   :  { %v153_v37 = vpop.permute.xlu1 %152  ;;  %2596 = vrot.lane.b32.xlu0 %v2583_v34, %s3329_s21 }
 0x100   :  { %v161_v39 = vsel %vm160_vm9, %v151_v35, %v153_v37  ;;  %v764_v35 = vpack.c.bf16 %v754_v18, %v754_v18 }
 0x101   :  { %v155_v40 = vpop.permute.xlu0 %154  ;;  %2598 = vrot.lane.b32.xlu1 %v2587_v36, %s3329_s21  ;;  %v171_v46 = vsel %vm169_vm11, %v161_v39, 0  ;;  %v761_v36 = vcombine.high %v755_v28, %v755_v28 }
 0x102   :  { %v162_v42 = vsel %vm160_vm9, %v153_v37, %v155_v40 }
 0x103   :  { %3130 = vmatprep.subr.msk.bf16.mxu0 %vm169_vm11, %v162_v42  ;;  %v157_v45 = vpop.permute.xlu1 %156  ;;  %2600 = vrot.lane.b32.xlu0 %v2591_v38, %s3329_s21  ;;  %v772_v42 = vsel %vm169_vm11, %v764_v35, 0  ;;  %v767_v44 = vpack.c.bf16 %v761_v36, %v761_v36  ;;  %v3175_v36 = vld [vmem:[%s4094_s2 + $0x20] sm:$0xf] }
 0x104   :  { %197 = vmatpush1.bf16.msra.mxu0 %v171_v46  ;;  %v164_v47 = vsel %vm160_vm9, %v157_v45, %v159_v31  ;;  %v163_v48 = vsel %vm160_vm9, %v155_v40, %v157_v45  ;;  %v3145_v40 = vld [vmem:[%s4094_s2 + $0xc] sm:$0xf]  ;;  %v766_v45 = vpack.c.bf16 %v755_v28, %v755_v28 }
 0x105   :  { %3132 = vmatprep.subr.msk.bf16.mxu1 %vm169_vm11, %v164_v47  ;;  %v272_v50 = vpop.permute.xlu0 %271  ;;  %v177_v51 = vsel %vm169_vm11, %v163_v48, 0  ;;  %2602 = vrot.lane.b32.xlu1 %v2595_v41, %s3329_s21 }
 0x106   :  { %v280_v52 = vsel %vm279_vm10, %v270_v27, %v272_v50  ;;  %238 = vmatpush1.bf16.msra.mxu1 %v177_v51  ;;  %v281_v53 = vsel %vm279_vm10, %v272_v50, %v274_v32  ;;  %v760_v27 = vcombine.high %v754_v18, %v754_v18  ;;  %v778_v51 = vsel %vm169_vm11, %v766_v45, 0 }
 0x107   :  { %3131 = vmatmul.mubr.msk.bf16.vlgmr.msra.gmra.mxu0 %vm165_vm12, %v3129_v49  ;;  %v278_v56 = vpop.permute.xlu1 %277  ;;  %3134 = vmatprep.subr.msk.bf16.mxu0 %vm169_vm11, %v281_v53  ;;  %v288_v57 = vsel %vm169_vm11, %v280_v52, 0  ;;  %v3151_v53 = vld [vmem:[%s4094_s2 + $0x10] sm:$0xf]  ;;  %v2927_v45 = vrot.slane %v3652_v1, %v3380_v8 }
 0x108   :  { %314 = vmatpush1.bf16.msra.mxu0 %v288_v57  ;;  %331 = vmatprep.mubr.bf16.mxu0 %v3332_v58  ;;  %v765_v34 = vpack.c.bf16 %v760_v27, %v760_v27 }
 0x109   :  { %3133 = vmatmul.mubr.msk.bf16.vlgmr.msra.gmra.mxu1 %vm165_vm12, %v3129_v49  ;;  %v440_v59 = vpop.permute.xlu0 %439  ;;  %2762 = vrot.lane.b32.xlu0 %v2749_v43, %s3330_s22 }
 0x10a   :  { %372 = vmatprep.mubr.bf16.mxu1 %v3332_v58  ;;  %2764 = vrot.lane.b32.xlu1 %v2753_v55, %s3330_s22 }
 0x10b   :  { %v442_v0 = vpop.permute.xlu1 %441 }
 0x10c   :  { %v450_v16 = vsel %vm449_vm8, %v440_v59, %v442_v0 }
 0x10d   :  { %v276_v3 = vpop.permute.xlu0 %275  ;;  %2766 = vrot.lane.b32.xlu0 %v2757_v62, %s3330_s22  ;;  %v458_v23 = vsel %vm169_vm11, %v450_v16, 0 }
 0x10e   :  { %v282_v11 = vsel %vm279_vm10, %v274_v32, %v276_v3  ;;  %v283_v12 = vsel %vm279_vm10, %v276_v3, %v278_v56  ;;  %2768 = vrot.lane.b32.xlu1 %v2761_v63, %s3330_s22  ;;  %v3157_v63 = vld [vmem:[%s4094_s2 + $0x14] sm:$0xf] }
 0x10f   :  { %v614_v14 = vpop.permute.xlu1 %613  ;;  %3135 = vmatmul.mubr.msk.bf16.vlgmr.msra.gmra.mxu0 %vm165_vm12, %v83_v2  ;;  %3136 = vmatprep.subr.msk.bf16.mxu1 %vm169_vm11, %v283_v12  ;;  %v294_v15 = vsel %vm169_vm11, %v282_v11, 0 }
 0x110   :  { %355 = vmatpush1.bf16.msra.mxu1 %v294_v15  ;;  %501 = vmatprep.mubr.bf16.mxu0 %v3332_v58 }
 0x111   :  { %v444_v17 = vpop.permute.xlu0 %443 }
 0x112   :  { %v451_v20 = vsel %vm449_vm8, %v442_v0, %v444_v17  ;;  %2928 = vrot.lane.b32.xlu1 %v2915_v13, %s3331_s23  ;;  %v3163_v13 = vld [vmem:[%s4094_s2 + $0x18] sm:$0xf] }
 0x113   :  { %v446_v22 = vpop.permute.xlu1 %445  ;;  %3137 = vmatmul.mubr.msk.bf16.vlgmr.msra.gmra.mxu1 %vm165_vm12, %v83_v2  ;;  %3140 = vmatprep.subr.msk.bf16.mxu0 %vm169_vm11, %v451_v20 }
 0x114   :  { %v452_v24 = vsel %vm449_vm8, %v444_v17, %v446_v22  ;;  %484 = vmatpush1.bf16.msra.mxu0 %v458_v23  ;;  %542 = vmatprep.mubr.bf16.mxu1 %v3332_v58 }
 0x115   :  { %v448_v26 = vpop.permute.xlu0 %447  ;;  %v464_v33 = vsel %vm169_vm11, %v452_v24, 0 }
 0x116   :  { %v453_v30 = vsel %vm449_vm8, %v446_v22, %v448_v26  ;;  %2932 = vrot.lane.b32.xlu1 %v2923_v21, %s3331_s23 }
 0x117   :  { %v618_v31 = vpop.permute.xlu1 %617  ;;  %3141 = vmatmul.mubr.msk.bf16.vlgmr.msra.gmra.mxu0 %vm165_vm12, %v3139_v25  ;;  %3142 = vmatprep.subr.msk.bf16.mxu1 %vm169_vm11, %v453_v30 }
 0x118   :  { %525 = vmatpush1.bf16.msra.mxu1 %v464_v33  ;;  %675 = vmatprep.mubr.bf16.mxu0 %v3332_v58 }
 0x119   :  { %v616_v32 = vpop.permute.xlu0 %615 }
 0x11a   :  { %v624_v29 = vsel %vm623_vm7, %v614_v14, %v616_v32  ;;  %v625_v37 = vsel %vm623_vm7, %v616_v32, %v618_v31 }
 0x11b   :  { %v632_v38 = vsel %vm169_vm11, %v624_v29, 0  ;;  %v622_v39 = vpop.permute.xlu1 %621  ;;  %3143 = vmatmul.mubr.msk.bf16.vlgmr.msra.gmra.mxu1 %vm165_vm12, %v3139_v25  ;;  %3146 = vmatprep.subr.msk.bf16.mxu0 %vm169_vm11, %v625_v37  ;;  %v3169_v25 = vld [vmem:[%s4094_s2 + $0x1c] sm:$0xf] }
 0x11c   :  { %658 = vmatpush1.bf16.msra.mxu0 %v632_v38  ;;  %716 = vmatprep.mubr.bf16.mxu1 %v3332_v58 }
 0x11d   :  { %v620_v41 = vpop.permute.xlu0 %619  ;;  %3152 = vmatprep.subr.msk.bf16.mxu0 %vm169_vm11, %v765_v34 }
 0x11e   :  { %v626_v46 = vsel %vm623_vm7, %v618_v31, %v620_v41  ;;  %v627_v47 = vsel %vm623_vm7, %v620_v41, %v622_v39 }
 0x11f   :  { %v638_v48 = vsel %vm169_vm11, %v626_v46, 0  ;;  %v930_v49 = vpop.permute.xlu1 %929  ;;  %3147 = vmatmul.mubr.msk.bf16.vlgmr.msra.gmra.mxu0 %vm165_vm12, %v3145_v40  ;;  %3148 = vmatprep.subr.msk.bf16.mxu1 %vm169_vm11, %v627_v47 }
 0x120   :  { %699 = vmatpush1.bf16.msra.mxu1 %v638_v48  ;;  %798 = vmatpush1.bf16.msra.mxu0 %v772_v42 }
 0x121   :  { %v928_v50 = vpop.permute.xlu0 %927  ;;  %815 = vmatprep.mubr.bf16.mxu0 %v3332_v58  ;;  %3154 = vmatprep.subr.msk.bf16.mxu1 %vm169_vm11, %v767_v44  ;;  %v2919_v44 = vrot.slane %v3652_v1, %v3376_v6 }
 0x122   :  { %v938_v52 = vsel %vm585_vm6, %v928_v50, %v930_v49 }
 0x123   :  { %v1102_v43 = vpop.permute.xlu1 %1101  ;;  %3149 = vmatmul.mubr.msk.bf16.vlgmr.msra.gmra.mxu1 %vm165_vm12, %v3145_v40  ;;  %v946_v56 = vsel %vm169_vm11, %v938_v52, 0 }
 0x124   :  { %839 = vmatpush1.bf16.msra.mxu1 %v778_v51  ;;  %856 = vmatprep.mubr.bf16.mxu1 %v3332_v58 }
 0x125   :  { %v932_v54 = vpop.permute.xlu0 %931 }
 0x126   :  { %v939_v55 = vsel %vm585_vm6, %v930_v49, %v932_v54 }
 0x127   :  { %v1106_v57 = vpop.permute.xlu1 %1105  ;;  %3153 = vmatmul.mubr.msk.bf16.vlgmr.msra.gmra.mxu0 %vm165_vm12, %v3151_v53  ;;  %3158 = vmatprep.subr.msk.bf16.mxu0 %vm169_vm11, %v939_v55 }
 0x128   :  { %972 = vmatpush1.bf16.msra.mxu0 %v946_v56  ;;  %989 = vmatprep.mubr.bf16.mxu0 %v3332_v58 }
 0x129   :  { %v936_v59 = vpop.permute.xlu0 %935 }
 0x12b   :  { %v934_v60 = vpop.permute.xlu1 %933  ;;  %3155 = vmatmul.mubr.msk.bf16.vlgmr.msra.gmra.mxu1 %vm165_vm12, %v3151_v53 }
 0x12c   :  { %v940_v61 = vsel %vm585_vm6, %v932_v54, %v934_v60  ;;  %v941_v62 = vsel %vm585_vm6, %v934_v60, %v936_v59  ;;  %1030 = vmatprep.mubr.bf16.mxu1 %v3332_v58 }
 0x12d   :  { %v952_v0 = vsel %vm169_vm11, %v940_v61, 0  ;;  %3160 = vmatprep.subr.msk.bf16.mxu1 %vm169_vm11, %v941_v62  ;;  %v1104_v2 = vpop.permute.xlu0 %1103 }
 0x12e   :  { %v1112_v3 = vsel %vm411_vm5, %v1102_v43, %v1104_v2  ;;  %v1113_v4 = vsel %vm411_vm5, %v1104_v2, %v1106_v57  ;;  %1013 = vmatpush1.bf16.msra.mxu1 %v952_v0 }
 0x12f   :  { %v1120_v9 = vsel %vm169_vm11, %v1112_v3, 0  ;;  %v1110_v10 = vpop.permute.xlu1 %1109  ;;  %3159 = vmatmul.mubr.msk.bf16.vlgmr.msra.gmra.mxu0 %vm165_vm12, %v3157_v63  ;;  %3164 = vmatprep.subr.msk.bf16.mxu0 %vm169_vm11, %v1113_v4 }
 0x130   :  { %1146 = vmatpush1.bf16.msra.mxu0 %v1120_v9  ;;  %1163 = vmatprep.mubr.bf16.mxu0 %v3332_v58 }
 0x131   :  { %v1276_v11 = vpop.permute.xlu0 %1275 }
 0x133   :  { %v1278_v12 = vpop.permute.xlu1 %1277  ;;  %3161 = vmatmul.mubr.msk.bf16.vlgmr.msra.gmra.mxu1 %vm165_vm12, %v3157_v63 }
 0x134   :  { %1204 = vmatprep.mubr.bf16.mxu1 %v3332_v58  ;;  %v1286_v19 = vsel %vm122_vm3, %v1276_v11, %v1278_v12 }
 0x135   :  { %v1108_v14 = vpop.permute.xlu0 %1107  ;;  %v1294_v22 = vsel %vm169_vm11, %v1286_v19, 0 }
 0x136   :  { %v1114_v15 = vsel %vm411_vm5, %v1106_v57, %v1108_v14  ;;  %v1115_v16 = vsel %vm411_vm5, %v1108_v14, %v1110_v10 }
 0x137   :  { %v1126_v17 = vsel %vm169_vm11, %v1114_v15, 0  ;;  %v1450_v18 = vpop.permute.xlu1 %1449  ;;  %3165 = vmatmul.mubr.msk.bf16.vlgmr.msra.gmra.mxu0 %vm165_vm12, %v3163_v13  ;;  %3166 = vmatprep.subr.msk.bf16.mxu1 %vm169_vm11, %v1115_v16 }
 0x138   :  { %1187 = vmatpush1.bf16.msra.mxu1 %v1126_v17  ;;  %1337 = vmatprep.mubr.bf16.mxu0 %v3332_v58 }
 0x139   :  { %v1280_v20 = vpop.permute.xlu0 %1279 }
 0x13a   :  { %v1287_v21 = vsel %vm122_vm3, %v1278_v12, %v1280_v20 }
 0x13b   :  { %v1282_v23 = vpop.permute.xlu1 %1281  ;;  %3167 = vmatmul.mubr.msk.bf16.vlgmr.msra.gmra.mxu1 %vm165_vm12, %v3163_v13  ;;  %3170 = vmatprep.subr.msk.bf16.mxu0 %vm169_vm11, %v1287_v21 }
 0x13c   :  { %v1288_v24 = vsel %vm122_vm3, %v1280_v20, %v1282_v23  ;;  %1320 = vmatpush1.bf16.msra.mxu0 %v1294_v22  ;;  %1378 = vmatprep.mubr.bf16.mxu1 %v3332_v58 }
 0x13d   :  { %v1284_v26 = vpop.permute.xlu0 %1283  ;;  %v1300_v28 = vsel %vm169_vm11, %v1288_v24, 0 }
 0x13e   :  { %v1289_v27 = vsel %vm122_vm3, %v1282_v23, %v1284_v26 }
 0x13f   :  { %v1454_v30 = vpop.permute.xlu1 %1453  ;;  %3171 = vmatmul.mubr.msk.bf16.vlgmr.msra.gmra.mxu0 %vm165_vm12, %v3169_v25  ;;  %3172 = vmatprep.subr.msk.bf16.mxu1 %vm169_vm11, %v1289_v27 }
 0x140   :  { %1361 = vmatpush1.bf16.msra.mxu1 %v1300_v28  ;;  %1511 = vmatprep.mubr.bf16.mxu0 %v3332_v58 }
 0x141   :  { %v1452_v31 = vpop.permute.xlu0 %1451 }
 0x142   :  { %v1460_v33 = vsel %vm72_vm2, %v1450_v18, %v1452_v31  ;;  %v1461_v32 = vsel %vm72_vm2, %v1452_v31, %v1454_v30 }
 0x143   :  { %v1468_v34 = vsel %vm169_vm11, %v1460_v33, 0  ;;  %v1458_v35 = vpop.permute.xlu1 %1457  ;;  %3173 = vmatmul.mubr.msk.bf16.vlgmr.msra.gmra.mxu1 %vm165_vm12, %v3169_v25  ;;  %3176 = vmatprep.subr.msk.bf16.mxu0 %vm169_vm11, %v1461_v32 }
 0x144   :  { %1494 = vmatpush1.bf16.msra.mxu0 %v1468_v34  ;;  %1552 = vmatprep.mubr.bf16.mxu1 %v3332_v58 }
 0x145   :  { %v1456_v29 = vpop.permute.xlu0 %1455 }
 0x146   :  { %v1462_v37 = vsel %vm72_vm2, %v1454_v30, %v1456_v29  ;;  %v1463_v38 = vsel %vm72_vm2, %v1456_v29, %v1458_v35 }
 0x147   :  { %v1474_v39 = vsel %vm169_vm11, %v1462_v37, 0  ;;  %3177 = vmatmul.mubr.msk.bf16.vlgmr.msra.gmra.mxu0 %vm165_vm12, %v3175_v36  ;;  %3178 = vmatprep.subr.msk.bf16.mxu1 %vm169_vm11, %v1463_v38  ;;  %v3775_v40 = vpop.permute.xlu1 %1681 }
 0x148   :  { %1535 = vmatpush1.bf16.msra.mxu1 %v1474_v39  ;;  %v1697_v41 = vmul.f32 0.0, %v3775_v40  ;;  %1776 = vmatprep.mubr.bf16.mxu0 %v3332_v58 }
 0x14a   :  { %v1704_v42 = vpack.c.bf16 %v1697_v41, %v1697_v41 }
 0x14b   :  { %3179 = vmatmul.mubr.msk.bf16.vlgmr.msra.gmra.mxu1 %vm165_vm12, %v3175_v36 }
 0x14c   :  { %1714 = vrot.lane.b32.xlu0 %v1704_v42, %s3330_s22  ;;  %1817 = vmatprep.mubr.bf16.mxu1 %v3332_v58 }
 0x150   :  { %2930 = vrot.lane.b32.xlu0 %v2919_v44, %s3331_s23 }
 0x152   :  { %v3788_v46 = vpop.permute.xlu0 %1572 }
 0x154   :  { %2934 = vrot.lane.b32.xlu0 %v2927_v45, %s3331_s23 }
 0x156   :  { %v3790_v47 = vpop.permute.xlu0 %1685 }
 0x15a   :  { %v3792_v48 = vpop.permute.xlu0 %1636 }
 0x15b   :  { %v1652_v49 = vmul.f32 0.0, %v3792_v48 }
 0x15d   :  { %v1658_v50 = vpack.c.bf16 %v1652_v49, %v1652_v49 }
 0x15f   :  { %1831 = vrot.lane.b32.xlu1 %v1658_v50, %s3331_s23 }
 0x1c7   :  { %v216_v51 = vpop.f32.mrf.mxu0 }
 0x1c9   :  { %v218_v43 = vpop.f32.mrf.mxu0  ;;  %v257_v52 = vpop.f32.mrf.mxu1 }
 0x1cb   :  { %v220_v53 = vpop.f32.mrf.mxu0  ;;  %v259_v54 = vpop.f32.mrf.mxu1 }
 0x1cd   :  { %v221_v55 = vpop.f32.mrf.mxu0  ;;  %v261_v1 = vpop.f32.mrf.mxu1 }
 0x1cf   :  { %v262_v56 = vpop.f32.mrf.mxu1  ;;  %v333_v57 = vpop.f32.mrf.mxu0 }
 0x1d0   :  { %v334_v42 = vadd.f32 %v333_v57, %v216_v51  ;;  %v3796_v51 = vpop.permute.xlu1 %1683 }
 0x1d1   :  { %v335_v59 = vpop.f32.mrf.mxu0 }
 0x1d2   :  { %v336_v49 = vadd.f32 %v335_v59, %v218_v43 }
 0x1d3   :  { %v337_v60 = vpop.f32.mrf.mxu0  ;;  %v374_v61 = vpop.f32.mrf.mxu1 }
 0x1d4   :  { %v375_v1 = vadd.f32 %v374_v61, %v257_v52 }
 0x1d5   :  { %v338_v62 = vpop.f32.mrf.mxu0  ;;  %v376_v63 = vpop.f32.mrf.mxu1 }
 0x1d7   :  { %v378_v0 = vpop.f32.mrf.mxu1  ;;  %v503_v2 = vpop.f32.mrf.mxu0 }
 0x1d8   :  { %v551_v50 = vadd.f32 %v503_v2, %v334_v42 }
 0x1d9   :  { %v379_v3 = vpop.f32.mrf.mxu1  ;;  %v505_v4 = vpop.f32.mrf.mxu0 }
 0x1da   :  { %v552_v56 = vadd.f32 %v505_v4, %v336_v49  ;;  %v377_v3 = vadd.f32 %v376_v63, %v259_v54 }
 0x1db   :  { %v507_v9 = vpop.f32.mrf.mxu0  ;;  %v544_v10 = vpop.f32.mrf.mxu1 }
 0x1dc   :  { %v553_v9 = vadd.f32 %v544_v10, %v375_v1 }
 0x1dd   :  { %v508_v11 = vpop.f32.mrf.mxu0  ;;  %v546_v12 = vpop.f32.mrf.mxu1 }
 0x1df   :  { %v548_v13 = vpop.f32.mrf.mxu1  ;;  %v677_v14 = vpop.f32.mrf.mxu0 }
 0x1e0   :  { %v725_v60 = vadd.f32 %v677_v14, %v551_v50 }
 0x1e1   :  { %v549_v15 = vpop.f32.mrf.mxu1  ;;  %v679_v16 = vpop.f32.mrf.mxu0 }
 0x1e2   :  { %v726_v11 = vadd.f32 %v679_v16, %v552_v56 }
 0x1e3   :  { %v681_v17 = vpop.f32.mrf.mxu0  ;;  %v718_v18 = vpop.f32.mrf.mxu1 }
 0x1e5   :  { %v682_v19 = vpop.f32.mrf.mxu0  ;;  %v720_v20 = vpop.f32.mrf.mxu1 }
 0x1e6   :  { %v554_v19 = vadd.f32 %v546_v12, %v377_v3  ;;  %v3798_v12 = vpop.permute.xlu1 %1687 }
 0x1e7   :  { %v722_v21 = vpop.f32.mrf.mxu1  ;;  %v817_v22 = vpop.f32.mrf.mxu0 }
 0x1e8   :  { %v865_v13 = vadd.f32 %v817_v22, %v725_v60  ;;  %v727_v21 = vadd.f32 %v718_v18, %v553_v9 }
 0x1e9   :  { %v723_v23 = vpop.f32.mrf.mxu1  ;;  %v819_v24 = vpop.f32.mrf.mxu0 }
 0x1ea   :  { %v866_v57 = vadd.f32 %v819_v24, %v726_v11  ;;  %v728_v23 = vadd.f32 %v720_v20, %v554_v19 }
 0x1eb   :  { %v821_v25 = vpop.f32.mrf.mxu0  ;;  %v858_v26 = vpop.f32.mrf.mxu1 }
 0x1ec   :  { %v867_v52 = vadd.f32 %v858_v26, %v727_v21 }
 0x1ed   :  { %v822_v27 = vpop.f32.mrf.mxu0  ;;  %v860_v28 = vpop.f32.mrf.mxu1 }
 0x1ee   :  { %v868_v54 = vadd.f32 %v860_v28, %v728_v23 }
 0x1ef   :  { %v862_v30 = vpop.f32.mrf.mxu1  ;;  %v991_v31 = vpop.f32.mrf.mxu0 }
 0x1f0   :  { %v1039_v43 = vadd.f32 %v991_v31, %v865_v13 }
 0x1f1   :  { %v863_v33 = vpop.f32.mrf.mxu1  ;;  %v993_v32 = vpop.f32.mrf.mxu0 }
 0x1f2   :  { %v1040_v61 = vadd.f32 %v993_v32, %v866_v57 }
 0x1f3   :  { %v995_v34 = vpop.f32.mrf.mxu0  ;;  %v1032_v35 = vpop.f32.mrf.mxu1 }
 0x1f4   :  { %v1041_v63 = vadd.f32 %v1032_v35, %v867_v52 }
 0x1f5   :  { %v996_v36 = vpop.f32.mrf.mxu0  ;;  %v1034_v29 = vpop.f32.mrf.mxu1 }
 0x1f6   :  { %v1042_v18 = vadd.f32 %v1034_v29, %v868_v54 }
 0x1f7   :  { %v1036_v37 = vpop.f32.mrf.mxu1  ;;  %v1165_v38 = vpop.f32.mrf.mxu0 }
 0x1f8   :  { %v1213_v4 = vadd.f32 %v1165_v38, %v1039_v43 }
 0x1f9   :  { %v1037_v39 = vpop.f32.mrf.mxu1  ;;  %v1167_v41 = vpop.f32.mrf.mxu0 }
 0x1fa   :  { %v1214_v10 = vadd.f32 %v1167_v41, %v1040_v61 }
 0x1fb   :  { %v1169_v44 = vpop.f32.mrf.mxu0  ;;  %v1206_v45 = vpop.f32.mrf.mxu1 }
 0x1fc   :  { %v1215_v30 = vadd.f32 %v1206_v45, %v1041_v63 }
 0x1fd   :  { %v1170_v53 = vpop.f32.mrf.mxu0  ;;  %v1208_v55 = vpop.f32.mrf.mxu1 }
 0x1fe   :  { %v1216_v20 = vadd.f32 %v1208_v55, %v1042_v18  ;;  %v3802_v53 = vpop.permute.xlu1 %1638 }
 0x1ff   :  { %v1210_v62 = vpop.f32.mrf.mxu1  ;;  %v1339_v0 = vpop.f32.mrf.mxu0 }
 0x200   :  { %v1387_v16 = vadd.f32 %v1339_v0, %v1213_v4 }
 0x201   :  { %v1211_v15 = vpop.f32.mrf.mxu1  ;;  %v1341_v17 = vpop.f32.mrf.mxu0 }
 0x202   :  { %v1388_v24 = vadd.f32 %v1341_v17, %v1214_v10  ;;  %v3806_v19 = vpop.permute.xlu1 %1642 }
 0x203   :  { %v1343_v59 = vpop.f32.mrf.mxu0  ;;  %v1380_v2 = vpop.f32.mrf.mxu1 }
 0x204   :  { %v1389_v26 = vadd.f32 %v1380_v2, %v1215_v30  ;;  %v3808_v59 = vpop.permute.xlu0 %1640 }
 0x205   :  { %v1344_v14 = vpop.f32.mrf.mxu0  ;;  %v1382_v25 = vpop.f32.mrf.mxu1 }
 0x206   :  { %v1390_v28 = vadd.f32 %v1382_v25, %v1216_v20  ;;  %v3814_v30 = vpop.permute.xlu1 %1962 }
 0x207   :  { %v1384_v22 = vpop.f32.mrf.mxu1  ;;  %v1513_v27 = vpop.f32.mrf.mxu0 }
 0x208   :  { %v1561_v31 = vadd.f32 %v1513_v27, %v1387_v16  ;;  %v1961_v20 = vpop.permute.xlu0 %1960 }
 0x209   :  { %v1385_v33 = vpop.f32.mrf.mxu1  ;;  %v1515_v34 = vpop.f32.mrf.mxu0 }
 0x20a   :  { %v1565_v32 = vmul.f32 6.744052e-05, %v1561_v31  ;;  %v1562_v36 = vadd.f32 %v1515_v34, %v1388_v24 }
 0x20b   :  { %v1517_v37 = vpop.f32.mrf.mxu0  ;;  %v1554_v38 = vpop.f32.mrf.mxu1 }
 0x20c   :  { %v1575_v35 = vadd.f32 %v3788_v46, %v1565_v32  ;;  %v1566_v39 = vmul.f32 6.744052e-05, %v1562_v36  ;;  %v1563_v41 = vadd.f32 %v1554_v38, %v1389_v26 }
 0x20d   :  { %v1518_v42 = vpop.f32.mrf.mxu0  ;;  %v1556_v44 = vpop.f32.mrf.mxu1 }
 0x20e   :  { %v1579_v49 = vmax.f32 %v1575_v35, 0.0  ;;  %v1576_v29 = vadd.f32 %v3788_v46, %v1566_v39  ;;  %v1567_v45 = vmul.f32 6.744052e-05, %v1563_v41  ;;  %v1564_v50 = vadd.f32 %v1556_v44, %v1390_v28 }
 0x20f   :  { %v1558_v55 = vpop.f32.mrf.mxu1  ;;  %v1689_v35 = vsel %vm122_vm3, %v3775_v40, %v3796_v51  ;;  %v1691_v40 = vsel %vm122_vm3, %v3790_v47, %v3798_v12 }
 0x210   :  { %v1583_v1 = vmul.f32 20.0, %v1579_v49  ;;  %v1580_v56 = vmax.f32 %v1576_v29, 0.0  ;;  %v1577_v60 = vadd.f32 %v3788_v46, %v1567_v45  ;;  %v1568_v62 = vmul.f32 6.744052e-05, %v1564_v50  ;;  %v1967_v29 = vpop.permute.xlu1 %1966  ;;  %v1965_v50 = vpop.permute.xlu0 %1964 }
 0x211   :  { %v1559_v0 = vpop.f32.mrf.mxu1 }
 0x212   :  { %v3250_v3 = vcvt.f32.s32 %v1583_v1  ;;  %v1584_v9 = vmul.f32 20.0, %v1580_v56  ;;  %v1581_v11 = vmax.f32 %v1577_v60, 0.0  ;;  %v1578_v13 = vadd.f32 %v3788_v46, %v1568_v62 }
 0x213   :  { %v3248_v21 = vand.u32 2147483647, %v1583_v1  ;;  %v3253_v23 = vand.u32 2147483648, %v1583_v1  ;;  %v1644_v62 = vsel %vm72_vm2, %v3792_v48, %v3802_v53  ;;  %v1645_v48 = vsel %vm72_vm2, %v3802_v53, %v3808_v59 }
 0x214   :  { %v3251_v15 = vcvt.s32.f32 %v3250_v3  ;;  %v3258_v17 = vcvt.f32.s32 %v1584_v9  ;;  %v1585_v57 = vmul.f32 20.0, %v1581_v11  ;;  %v1582_v43 = vmax.f32 %v1578_v13, 0.0  ;;  %v2129_v11 = vpop.permute.xlu1 %2128 }
 0x215   :  { %v3256_v52 = vand.u32 2147483647, %v1584_v9  ;;  %v3261_v63 = vand.u32 2147483648, %v1584_v9  ;;  %vm3249_vm13 = vcmp.lt.f32.partialorder %v3248_v21, 8388608.0  ;;  %v1646_v53 = vsel %vm72_vm2, %v3808_v59, %v3806_v19 }
 0x216   :  { %v3252_v2 = vand.u32 2147483647, %v3251_v15  ;;  %v3259_v61 = vcvt.s32.f32 %v3258_v17  ;;  %v3266_v4 = vcvt.f32.s32 %v1585_v57  ;;  %v1586_v14 = vmul.f32 20.0, %v1582_v43  ;;  %v2127_v43 = vpop.permute.xlu0 %2126 }
 0x217   :  { %vm3810_vm14 = vcmp.lt.f32.partialorder %v3256_v52, 8388608.0  ;;  %v3264_v18 = vand.u32 2147483647, %v1585_v57  ;;  %v3269_v33 = vand.u32 2147483648, %v1585_v57  ;;  %v1976_v59 = vmul.f32 0.0, %v1961_v20 }
 0x218   :  { %v3254_v25 = vor.u32 %v3253_v23, %v3252_v2  ;;  %v3260_v54 = vand.u32 2147483647, %v3259_v61  ;;  %v3267_v46 = vcvt.s32.f32 %v3266_v4  ;;  %v3274_v10 = vcvt.f32.s32 %v1586_v14  ;;  %v2133_v61 = vpop.permute.xlu1 %2132 }
 0x219   :  { %v3272_v32 = vand.u32 2147483647, %v1586_v14  ;;  %v3277_v28 = vand.u32 2147483648, %v1586_v14  ;;  %vm3265_vm15 = vcmp.lt.f32.partialorder %v3264_v18, 8388608.0 }
 0x21a   :  { %v3255_v16 = vsel %vm3249_vm13, %v3254_v25, %v1583_v1  ;;  %v3262_v27 = vor.u32 %v3261_v63, %v3260_v54  ;;  %v3268_v31 = vand.u32 2147483647, %v3267_v46  ;;  %v3275_v34 = vcvt.s32.f32 %v3274_v10  ;;  %v2131_v4 = vpop.permute.xlu0 %2130 }
 0x21b   :  { %v1595_v24 = vmax.f32 %v3255_v16, 0.0  ;;  %vm3273_vm0 = vcmp.lt.f32.partialorder %v3272_v32, 8388608.0  ;;  %v1970_v63 = vsel %vm411_vm5, %v1965_v50, %v1967_v29 }
 0x21c   :  { %v3263_v26 = vsel %vm3810_vm14, %v3262_v27, %v1584_v9  ;;  %v3270_v37 = vor.u32 %v3269_v33, %v3268_v31  ;;  %v3276_v38 = vand.u32 2147483647, %v3275_v34  ;;  %v1690_v9 = vsel %vm122_vm3, %v3796_v51, %v3790_v47  ;;  %v2433_v46 = vpop.permute.xlu1 %2432 }
 0x21d   :  { %v3818_v36 = vmin.f32 %v1595_v24, 255.0  ;;  %v1596_v39 = vmax.f32 %v3263_v26, 0.0  ;;  %v1969_v27 = vsel %vm411_vm5, %v3814_v30, %v1965_v50  ;;  %v2142_v24 = vmul.f32 0.0, %v2127_v43 }
 0x21e   :  { %v3271_v41 = vsel %vm3265_vm15, %v3270_v37, %v1585_v57  ;;  %v3278_v42 = vor.u32 %v3277_v28, %v3276_v38  ;;  %v1968_v57 = vsel %vm411_vm5, %v1961_v20, %v3814_v30  ;;  %v2431_v18 = vpop.permute.xlu0 %2430  ;;  %v2135_v34 = vsel %vm585_vm6, %v2129_v11, %v2131_v4 }
 0x21f   :  { %v1597_v44 = vmax.f32 %v3271_v41, 0.0  ;;  %v1698_v49 = vmul.f32 %v1689_v35, %v3818_v36  ;;  %v3826_v1 = vmin.f32 %v1596_v39, 255.0  ;;  %v1653_v0 = vmul.f32 %v1644_v62, %v3818_v36 }
 0x220   :  { %v3279_v45 = vsel %vm3273_vm0, %v3278_v42, %v1586_v14  ;;  %v1977_v52 = vmul.f32 %v1968_v57, %v3818_v36  ;;  %v2149_v20 = vpack.c.bf16 %v2142_v24, %v2142_v24  ;;  %v2437_v26 = vpop.permute.xlu1 %2436  ;;  %v2134_v28 = vsel %vm585_vm6, %v2127_v43, %v2129_v11 }
 0x221   :  { %v3824_v55 = vmin.f32 %v1597_v44, 255.0  ;;  %v1598_v56 = vmax.f32 %v3279_v45, 0.0  ;;  %v1705_v60 = vpack.c.bf16 %v1698_v49, %v1698_v49  ;;  %v1659_v15 = vpack.c.bf16 %v1653_v0, %v1653_v0 }
 0x222   :  { %v1699_v21 = vmul.f32 %v1690_v9, %v3826_v1  ;;  %v1654_v47 = vmul.f32 %v1645_v48, %v3826_v1  ;;  %v1984_v54 = vpack.c.bf16 %v1977_v52, %v1977_v52  ;;  %v1978_v33 = vmul.f32 %v1969_v27, %v3826_v1  ;;  %v2435_v32 = vpop.permute.xlu0 %2434 }
 0x223   :  { %1716 = vrot.lane.b32.xlu1 %v1705_v60, %s3330_s22  ;;  %v1700_v3 = vmul.f32 %v1691_v40, %v3824_v55  ;;  %v3840_v13 = vmin.f32 %v1598_v56, 255.0  ;;  %1833 = vrot.lane.b32.xlu0 %v1659_v15, %s3331_s23  ;;  %v1655_v25 = vmul.f32 %v1646_v53, %v3824_v55  ;;  %v1979_v22 = vmul.f32 %v1970_v63, %v3824_v55 }
 0x224   :  { %v1706_v51 = vpack.c.bf16 %v1699_v21, %v1699_v21  ;;  %v1660_v23 = vpack.c.bf16 %v1654_v47, %v1654_v47  ;;  %v1985_v30 = vpack.c.bf16 %v1978_v33, %v1978_v33  ;;  %v2144_v38 = vmul.f32 %v2135_v34, %v3826_v1  ;;  %v2599_v35 = vpop.permute.xlu1 %2598 }
 0x225   :  { %v1707_v17 = vpack.c.bf16 %v1700_v3, %v1700_v3  ;;  %v1701_v2 = vmul.f32 %v3798_v12, %v3840_v13  ;;  %v1656_v12 = vmul.f32 %v3806_v19, %v3840_v13  ;;  %v1661_v10 = vpack.c.bf16 %v1655_v25, %v1655_v25 }
 0x226   :  { %v1983_v19 = vpack.c.bf16 %v1976_v59, %v1976_v59  ;;  %v1986_v31 = vpack.c.bf16 %v1979_v22, %v1979_v22  ;;  %v1980_v37 = vmul.f32 %v1967_v29, %v3840_v13  ;;  %v2143_v41 = vmul.f32 %v2134_v28, %v3818_v36  ;;  %v2597_v29 = vpop.permute.xlu0 %2596 }
 0x227   :  { %1720 = vrot.lane.b32.xlu1 %v1707_v17, %s3330_s22  ;;  %1718 = vrot.lane.b32.xlu0 %v1706_v51, %s3330_s22  ;;  %v1708_v14 = vpack.c.bf16 %v1701_v2, %v1701_v2  ;;  %v1662_v16 = vpack.c.bf16 %v1656_v12, %v1656_v12  ;;  %v2151_v42 = vpack.c.bf16 %v2144_v38, %v2144_v38  ;;  %v2450_v52 = vmul.f32 0.0, %v2437_v26 }
 0x228   :  { %v1987_v39 = vpack.c.bf16 %v1980_v37, %v1980_v37  ;;  %v2146_v44 = vmul.f32 %v2133_v61, %v3840_v13  ;;  %v2136_v49 = vsel %vm585_vm6, %v2131_v4, %v2133_v61  ;;  %v2438_v45 = vsel %vm623_vm7, %v2431_v18, %v2433_v46  ;;  %v2603_v62 = vpop.permute.xlu1 %2602 }
 0x229   :  { %v2150_v50 = vpack.c.bf16 %v2143_v41, %v2143_v41  ;;  %v2145_v56 = vmul.f32 %v2136_v49, %v3824_v55  ;;  %v2447_v40 = vmul.f32 %v2438_v45, %v3826_v1  ;;  %v2612_v3 = vmul.f32 %v2597_v29, %v3818_v36 }
 0x22a   :  { %v2153_v60 = vpack.c.bf16 %v2146_v44, %v2146_v44  ;;  %v2601_v0 = vpop.permute.xlu0 %2600  ;;  %v2446_v11 = vmul.f32 %v2431_v18, %v3818_v36  ;;  %v2439_v17 = vsel %vm623_vm7, %v2433_v46, %v2435_v32  ;;  %v2440_v2 = vsel %vm623_vm7, %v2435_v32, %v2437_v26 }
 0x22b   :  { %1835 = vrot.lane.b32.xlu1 %v1660_v23, %s3331_s23  ;;  %1722 = vrot.lane.b32.xlu0 %v1708_v14, %s3330_s22  ;;  %v2152_v9 = vpack.c.bf16 %v2145_v56, %v2145_v56  ;;  %v2454_v15 = vpack.c.bf16 %v2447_v40, %v2447_v40  ;;  %v2605_v21 = vsel %vm449_vm8, %v2599_v35, %v2601_v0  ;;  %v2616_v59 = vmul.f32 0.0, %v2603_v62 }
 0x22c   :  { %v2619_v48 = vpack.c.bf16 %v2612_v3, %v2612_v3  ;;  %v2614_v57 = vmul.f32 %v2605_v21, %v3824_v55  ;;  %v2765_v43 = vpop.permute.xlu1 %2764  ;;  %v2453_v47 = vpack.c.bf16 %v2446_v11, %v2446_v11  ;;  %v2448_v51 = vmul.f32 %v2439_v17, %v3824_v55  ;;  %v3080_v21 = vld [vmem:[%s4095_s5] sm:$0xff] }
 0x22d   :  { %v2449_v4 = vmul.f32 %v2440_v2, %v3840_v13  ;;  %v2604_v14 = vsel %vm449_vm8, %v2597_v29, %v2599_v35  ;;  %v2457_v12 = vpack.c.bf16 %v2450_v52, %v2450_v52  ;;  %v2623_v22 = vpack.c.bf16 %v2616_v59, %v2616_v59 }
 0x22e   :  { %v2763_v23 = vpop.permute.xlu0 %2762  ;;  %v2621_v53 = vpack.c.bf16 %v2614_v57, %v2614_v57  ;;  %v2455_v61 = vpack.c.bf16 %v2448_v51, %v2448_v51  ;;  %v2613_v63 = vmul.f32 %v2604_v14, %v3826_v1 }
 0x22f   :  { %1995 = vrot.lane.b32.xlu1 %v1984_v54, %s3329_s21  ;;  %1837 = vrot.lane.b32.xlu0 %v1661_v10, %s3331_s23  ;;  %v2456_v46 = vpack.c.bf16 %v2449_v4, %v2449_v4  ;;  %v2770_v10 = vsel %vm160_vm9, %v2763_v23, %v2765_v43  ;;  %v2778_v27 = vmul.f32 %v2763_v23, %v3818_v36 }
 0x230   :  { %v2769_v25 = vpop.permute.xlu1 %2768  ;;  %v2779_v18 = vmul.f32 %v2770_v10, %v3826_v1 }
 0x231   :  { %v2785_v34 = vpack.c.bf16 %v2778_v27, %v2778_v27  ;;  %v2782_v49 = vmul.f32 0.0, %v2769_v25 }
 0x232   :  { %v2767_v54 = vpop.permute.xlu0 %2766 }
 0x233   :  { %1839 = vrot.lane.b32.xlu1 %v1662_v16, %s3331_s23  ;;  %1993 = vrot.lane.b32.xlu0 %v1983_v19, %s3329_s21  ;;  %v2620_v16 = vpack.c.bf16 %v2613_v63, %v2613_v63  ;;  %v2606_v19 = vsel %vm449_vm8, %v2601_v0, %v2603_v62  ;;  %v2771_v32 = vsel %vm160_vm9, %v2765_v43, %v2767_v54 }
 0x234   :  { %v2929_v24 = vpop.permute.xlu1 %2928  ;;  %v2615_v33 = vmul.f32 %v2606_v19, %v3840_v13  ;;  %v2780_v35 = vmul.f32 %v2771_v32, %v3824_v55  ;;  %v2789_v40 = vpack.c.bf16 %v2782_v49, %v2782_v49 }
 0x235   :  { %v2944_v26 = vmul.f32 %v2929_v24, %v3818_v36 }
 0x236   :  { %v2622_v28 = vpack.c.bf16 %v2615_v33, %v2615_v33  ;;  %v2787_v44 = vpack.c.bf16 %v2780_v35, %v2780_v35  ;;  %v3191_v35 = vld [vmem:[%s4096_s4 + $0x8] sm:$0xf] }
 0x237   :  { %1999 = vrot.lane.b32.xlu1 %v1986_v31, %s3329_s21  ;;  %1997 = vrot.lane.b32.xlu0 %v1985_v30, %s3329_s21  ;;  %v1715_v31 = vpop.permute.xlu0 %1714  ;;  %v2772_v30 = vsel %vm160_vm9, %v2767_v54, %v2769_v25  ;;  %v2951_v41 = vpack.c.bf16 %v2944_v26, %v2944_v26  ;;  %v3181_v25 = vld [vmem:[%s4096_s4 + $0x4] sm:$0xf] }
 0x238   :  { %v2933_v37 = vpop.permute.xlu1 %2932 }
 0x23b   :  { %2159 = vrot.lane.b32.xlu1 %v2149_v20, %s3328_s20  ;;  %2001 = vrot.lane.b32.xlu0 %v1987_v39, %s3329_s21  ;;  %v2786_v20 = vpack.c.bf16 %v2779_v18, %v2779_v18  ;;  %v2931_v38 = vpop.permute.xlu0 %2930  ;;  %v2781_v39 = vmul.f32 %v2772_v30, %v3840_v13 }
 0x23d   :  { %v2788_v45 = vpack.c.bf16 %v2781_v39, %v2781_v39 }
 0x23f   :  { %2163 = vrot.lane.b32.xlu1 %v2151_v42, %s3328_s20  ;;  %2161 = vrot.lane.b32.xlu0 %v2150_v50, %s3328_s20  ;;  %v2937_v42 = vsel %vm279_vm10, %v2931_v38, %v2933_v37  ;;  %v2936_v50 = vsel %vm279_vm10, %v2929_v24, %v2931_v38  ;;  %v2935_v56 = vpop.permute.xlu0 %2934  ;;  %v1657_v24 = vld [vmem:[%s4096_s4] sm:$0xf] }
 0x240   :  { %v2946_v29 = vmul.f32 %v2937_v42, %v3824_v55  ;;  %v2945_v62 = vmul.f32 %v2936_v50, %v3826_v1  ;;  %v2938_v3 = vsel %vm279_vm10, %v2933_v37, %v2935_v56 }
 0x242   :  { %v2953_v0 = vpack.c.bf16 %v2946_v29, %v2946_v29  ;;  %v2952_v11 = vpack.c.bf16 %v2945_v62, %v2945_v62  ;;  %v3197_v62 = vld [vmem:[%s4096_s4 + $0xc] sm:$0xf] }
 0x243   :  { %2167 = vrot.lane.b32.xlu1 %v2153_v60, %s3328_s20  ;;  %2165 = vrot.lane.b32.xlu0 %v2152_v9, %s3328_s20  ;;  %v2948_v60 = vmul.f32 0.0, %v2935_v56 }
 0x245   :  { %v2955_v9 = vpack.c.bf16 %v2948_v60, %v2948_v60 }
 0x247   :  { %2465 = vrot.lane.b32.xlu1 %v2454_v15, %s3327_s17  ;;  %2463 = vrot.lane.b32.xlu0 %v2453_v47, %s3327_s17  ;;  %v2947_v15 = vmul.f32 %v2938_v3, %v3840_v13 }
 0x249   :  { %v2954_v17 = vpack.c.bf16 %v2947_v15, %v2947_v15 }
 0x24b   :  { %2629 = vrot.lane.b32.xlu1 %v2619_v48, %s3326_s15  ;;  %2467 = vrot.lane.b32.xlu0 %v2455_v61, %s3327_s17  ;;  %v1832_v48 = vpop.permute.xlu1 %1831 }
 0x24f   :  { %2633 = vrot.lane.b32.xlu1 %v2621_v53, %s3326_s15  ;;  %2471 = vrot.lane.b32.xlu0 %v2457_v12, %s3327_s17 }
 0x253   :  { %2469 = vrot.lane.b32.xlu1 %v2456_v46, %s3327_s17  ;;  %2631 = vrot.lane.b32.xlu0 %v2620_v16, %s3326_s15 }
 0x257   :  { %2637 = vrot.lane.b32.xlu1 %v2623_v22, %s3326_s15  ;;  %2795 = vrot.lane.b32.xlu0 %v2785_v34, %s3324_s27  ;;  %v3202_v34 = vld [vmem:[%s4091_s1 + $0x4] ss:$8 sm:$0xf] }
 0x258   :  { %v2283_v30 = vrot.slane %v3202_v34, %v3376_v6  ;;  %v2279_v38 = vrot.slane %v3202_v34, %v3374_v5  ;;  %v2291_v49 = vrot.slane %v3202_v34, %v3380_v8 }
 0x25a   :  { %v2297_v42 = vmul.f32 %v2283_v30, %v3826_v1  ;;  %v2296_v5 = vmul.f32 %v2279_v38, %v3818_v36  ;;  %v2299_v8 = vmul.f32 %v2291_v49, %v3840_v13  ;;  %v3221_v38 = vld [vmem:[%s4096_s4 + $0x1c] sm:$0xf] }
 0x25b   :  { %2797 = vrot.lane.b32.xlu1 %v2786_v20, %s3324_s27  ;;  %2635 = vrot.lane.b32.xlu0 %v2622_v28, %s3326_s15 }
 0x25c   :  { %v2303_v60 = vpack.c.bf16 %v2297_v42, %v2297_v42  ;;  %v2302_v36 = vpack.c.bf16 %v2296_v5, %v2296_v5  ;;  %v2305_v13 = vpack.c.bf16 %v2299_v8, %v2299_v8 }
 0x25f   :  { %2961 = vrot.lane.b32.xlu1 %v2951_v41, %s3325_s28  ;;  %2799 = vrot.lane.b32.xlu0 %v2787_v44, %s3324_s27 }
 0x263   :  { %2801 = vrot.lane.b32.xlu1 %v2788_v45, %s3324_s27  ;;  %2803 = vrot.lane.b32.xlu0 %v2789_v40, %s3324_s27  ;;  %v2287_v45 = vrot.slane %v3202_v34, %v3378_v7 }
 0x265   :  { %v2298_v7 = vmul.f32 %v2287_v45, %v3824_v55  ;;  %v2310_v55 = vsel %vm74_vm4, %v2302_v36, 0  ;;  %v3227_v45 = vld [vmem:[%s4096_s4 + $0x20] sm:$0xf] }
 0x267   :  { %2965 = vrot.lane.b32.xlu1 %v2953_v0, %s3325_s28  ;;  %2963 = vrot.lane.b32.xlu0 %v2952_v11, %s3325_s28 }
 0x26b   :  { %2969 = vrot.lane.b32.xlu1 %v2955_v9, %s3325_s28  ;;  %2967 = vrot.lane.b32.xlu0 %v2954_v17, %s3325_s28  ;;  %v2304_v17 = vpack.c.bf16 %v2298_v7, %v2298_v7 }
 0x26f   :  { %3083 = vperm.xlu0 %3322, %v3080_v21  }
 0x295   :  { %v1717_v57 = vpop.permute.xlu1 %1716  ;;  %v1834_v43 = vpop.permute.xlu0 %1833 }
 0x296   :  { %v1724_v51 = vsel %vm160_vm9, %v1715_v31, %v1717_v57  ;;  %v1841_v4 = vsel %vm279_vm10, %v1832_v48, %v1834_v43 }
 0x297   :  { %v1733_v61 = vsel %vm74_vm4, %v1724_v51, 0  ;;  %v1849_v59 = vsel %vm74_vm4, %v1841_v4, 0 }
 0x299   :  { %v1721_v47 = vpop.permute.xlu1 %1720  ;;  %v1719_v2 = vpop.permute.xlu0 %1718 }
 0x29a   :  { %v1725_v52 = vsel %vm160_vm9, %v1717_v57, %v1719_v2  ;;  %v1726_v14 = vsel %vm160_vm9, %v1719_v2, %v1721_v47  ;;  %v2316_v57 = vsel %vm74_vm4, %v2304_v17, 0 }
 0x29b   :  { %3182 = vmatprep.subr.msk.bf16.mxu0 %vm74_vm4, %v1725_v52  ;;  %v1739_v46 = vsel %vm74_vm4, %v1726_v14, 0 }
 0x29c   :  { %1759 = vmatpush1.bf16.msra.mxu0 %v1733_v61 }
 0x29d   :  { %v1836_v23 = vpop.permute.xlu1 %1835  ;;  %v1723_v54 = vpop.permute.xlu0 %1722 }
 0x29e   :  { %v1842_v53 = vsel %vm279_vm10, %v1834_v43, %v1836_v23  ;;  %v1727_v63 = vsel %vm160_vm9, %v1721_v47, %v1723_v54  ;;  %v3203_v47 = vld [vmem:[%s4096_s4 + $0x10] sm:$0xf]  ;;  %v3209_v54 = vld [vmem:[%s4096_s4 + $0x14] sm:$0xf] }
 0x29f   :  { %3186 = vmatprep.subr.msk.bf16.mxu0 %vm74_vm4, %v1842_v53  ;;  %3183 = vmatmul.mubr.msk.bf16.vlgmr.msra.gmra.mxu0 %vm1728_vm1, %v3181_v25 }
 0x2a0   :  { %3184 = vmatprep.subr.msk.bf16.mxu1 %vm74_vm4, %v1727_v63  ;;  %1875 = vmatpush1.bf16.msra.mxu0 %v1849_v59 }
 0x2a1   :  { %v1996_v12 = vpop.permute.xlu1 %1995  ;;  %1800 = vmatpush1.bf16.msra.mxu1 %v1739_v46  ;;  %v1838_v10 = vpop.permute.xlu0 %1837  ;;  %1892 = vmatprep.mubr.bf16.mxu0 %v3332_v58 }
 0x2a2   :  { %v1843_v22 = vsel %vm279_vm10, %v1836_v23, %v1838_v10 }
 0x2a3   :  { %v1855_v18 = vsel %vm74_vm4, %v1843_v22, 0 }
 0x2a4   :  { %3185 = vmatmul.mubr.msk.bf16.vlgmr.msra.gmra.mxu1 %vm1728_vm1, %v3181_v25 }
 0x2a5   :  { %v1840_v16 = vpop.permute.xlu1 %1839  ;;  %1933 = vmatprep.mubr.bf16.mxu1 %v3332_v58  ;;  %v1994_v19 = vpop.permute.xlu0 %1993 }
 0x2a6   :  { %v1844_v27 = vsel %vm279_vm10, %v1838_v10, %v1840_v16  ;;  %v2003_v33 = vsel %vm449_vm8, %v1994_v19, %v1996_v12 }
 0x2a7   :  { %3188 = vmatprep.subr.msk.bf16.mxu1 %vm74_vm4, %v1844_v27  ;;  %3187 = vmatmul.mubr.msk.bf16.vlgmr.msra.gmra.mxu0 %vm1728_vm1, %v1657_v24  ;;  %v2011_v37 = vsel %vm74_vm4, %v2003_v33, 0  ;;  %v3215_v27 = vld [vmem:[%s4096_s4 + $0x18] sm:$0xf] }
 0x2a8   :  { %1916 = vmatpush1.bf16.msra.mxu1 %v1855_v18  ;;  %2054 = vmatprep.mubr.bf16.mxu0 %v3332_v58 }
 0x2a9   :  { %v2000_v31 = vpop.permute.xlu1 %1999  ;;  %v1998_v20 = vpop.permute.xlu0 %1997 }
 0x2aa   :  { %v2004_v32 = vsel %vm449_vm8, %v1996_v12, %v1998_v20  ;;  %v2005_v28 = vsel %vm449_vm8, %v1998_v20, %v2000_v31 }
 0x2ab   :  { %3192 = vmatprep.subr.msk.bf16.mxu0 %vm74_vm4, %v2004_v32  ;;  %v2017_v44 = vsel %vm74_vm4, %v2005_v28, 0 }
 0x2ac   :  { %3189 = vmatmul.mubr.msk.bf16.vlgmr.msra.gmra.mxu1 %vm1728_vm1, %v1657_v24  ;;  %2037 = vmatpush1.bf16.msra.mxu0 %v2011_v37 }
 0x2ad   :  { %v2160_v26 = vpop.permute.xlu1 %2159  ;;  %2095 = vmatprep.mubr.bf16.mxu1 %v3332_v58  ;;  %v2002_v39 = vpop.permute.xlu0 %2001 }
 0x2ae   :  { %v2006_v6 = vsel %vm449_vm8, %v2000_v31, %v2002_v39 }
 0x2af   :  { %3193 = vmatmul.mubr.msk.bf16.vlgmr.msra.gmra.mxu0 %vm1728_vm1, %v3191_v35  ;;  %3194 = vmatprep.subr.msk.bf16.mxu1 %vm74_vm4, %v2006_v6 }
 0x2b0   :  { %2078 = vmatpush1.bf16.msra.mxu1 %v2017_v44  ;;  %2220 = vmatprep.mubr.bf16.mxu0 %v3332_v58 }
 0x2b1   :  { %v2164_v41 = vpop.permute.xlu1 %2163  ;;  %v2162_v29 = vpop.permute.xlu0 %2161 }
 0x2b2   :  { %v2169_v56 = vsel %vm623_vm7, %v2160_v26, %v2162_v29  ;;  %v2170_v1 = vsel %vm623_vm7, %v2162_v29, %v2164_v41 }
 0x2b3   :  { %v2177_v40 = vsel %vm74_vm4, %v2169_v56, 0  ;;  %3198 = vmatprep.subr.msk.bf16.mxu0 %vm74_vm4, %v2170_v1 }
 0x2b4   :  { %3195 = vmatmul.mubr.msk.bf16.vlgmr.msra.gmra.mxu1 %vm1728_vm1, %v3191_v35  ;;  %2203 = vmatpush1.bf16.msra.mxu0 %v2177_v40 }
 0x2b5   :  { %v2168_v50 = vpop.permute.xlu1 %2167  ;;  %2261 = vmatprep.mubr.bf16.mxu1 %v3332_v58  ;;  %3204 = vmatprep.subr.msk.bf16.mxu0 %vm74_vm4, %v2303_v60  ;;  %v2166_v0 = vpop.permute.xlu0 %2165 }
 0x2b6   :  { %v2171_v9 = vsel %vm623_vm7, %v2164_v41, %v2166_v0  ;;  %v2172_v11 = vsel %vm623_vm7, %v2166_v0, %v2168_v50 }
 0x2b7   :  { %v2183_v15 = vsel %vm74_vm4, %v2171_v9, 0  ;;  %3199 = vmatmul.mubr.msk.bf16.vlgmr.msra.gmra.mxu0 %vm1728_vm1, %v3197_v62  ;;  %3200 = vmatprep.subr.msk.bf16.mxu1 %vm74_vm4, %v2172_v11 }
 0x2b8   :  { %2244 = vmatpush1.bf16.msra.mxu1 %v2183_v15  ;;  %2336 = vmatpush1.bf16.msra.mxu0 %v2310_v55 }
 0x2b9   :  { %v2466_v3 = vpop.permute.xlu1 %2465  ;;  %3206 = vmatprep.subr.msk.bf16.mxu1 %vm74_vm4, %v2305_v13  ;;  %v2464_v21 = vpop.permute.xlu0 %2463  ;;  %2353 = vmatprep.mubr.bf16.mxu0 %v3332_v58 }
 0x2ba   :  { %v2473_v43 = vsel %vm585_vm6, %v2464_v21, %v2466_v3 }
 0x2bb   :  { %v2481_v52 = vsel %vm74_vm4, %v2473_v43, 0 }
 0x2bc   :  { %3201 = vmatmul.mubr.msk.bf16.vlgmr.msra.gmra.mxu1 %vm1728_vm1, %v3197_v62 }
 0x2bd   :  { %v2630_v48 = vpop.permute.xlu1 %2629  ;;  %2377 = vmatpush1.bf16.msra.mxu1 %v2316_v57  ;;  %2394 = vmatprep.mubr.bf16.mxu1 %v3332_v58  ;;  %v2468_v51 = vpop.permute.xlu0 %2467 }
 0x2be   :  { %v2474_v23 = vsel %vm585_vm6, %v2466_v3, %v2468_v51 }
 0x2bf   :  { %3205 = vmatmul.mubr.msk.bf16.vlgmr.msra.gmra.mxu0 %vm1728_vm1, %v3203_v47  ;;  %3210 = vmatprep.subr.msk.bf16.mxu0 %vm74_vm4, %v2474_v23 }
 0x2c0   :  { %2507 = vmatpush1.bf16.msra.mxu0 %v2481_v52  ;;  %2524 = vmatprep.mubr.bf16.mxu0 %v3332_v58 }
 0x2c1   :  { %v2634_v2 = vpop.permute.xlu1 %2633  ;;  %v2472_v53 = vpop.permute.xlu0 %2471 }
 0x2c4   :  { %3207 = vmatmul.mubr.msk.bf16.vlgmr.msra.gmra.mxu1 %vm1728_vm1, %v3203_v47 }
 0x2c5   :  { %v2470_v61 = vpop.permute.xlu1 %2469  ;;  %2565 = vmatprep.mubr.bf16.mxu1 %v3332_v58  ;;  %v2632_v12 = vpop.permute.xlu0 %2631 }
 0x2c6   :  { %v2475_v4 = vsel %vm585_vm6, %v2468_v51, %v2470_v61  ;;  %v2476_v14 = vsel %vm585_vm6, %v2470_v61, %v2472_v53  ;;  %v2639_v59 = vsel %vm411_vm5, %v2630_v48, %v2632_v12  ;;  %v2640_v46 = vsel %vm411_vm5, %v2632_v12, %v2634_v2 }
 0x2c7   :  { %v2487_v25 = vsel %vm74_vm4, %v2475_v4, 0  ;;  %3212 = vmatprep.subr.msk.bf16.mxu1 %vm74_vm4, %v2476_v14  ;;  %v2647_v10 = vsel %vm74_vm4, %v2639_v59, 0  ;;  %3211 = vmatmul.mubr.msk.bf16.vlgmr.msra.gmra.mxu0 %vm1728_vm1, %v3209_v54 }
 0x2c8   :  { %2548 = vmatpush1.bf16.msra.mxu1 %v2487_v25  ;;  %3216 = vmatprep.subr.msk.bf16.mxu0 %vm74_vm4, %v2640_v46 }
 0x2c9   :  { %v2638_v63 = vpop.permute.xlu1 %2637  ;;  %2673 = vmatpush1.bf16.msra.mxu0 %v2647_v10  ;;  %2690 = vmatprep.mubr.bf16.mxu0 %v3332_v58  ;;  %v2796_v16 = vpop.permute.xlu0 %2795 }
 0x2cc   :  { %3213 = vmatmul.mubr.msk.bf16.vlgmr.msra.gmra.mxu1 %vm1728_vm1, %v3209_v54 }
 0x2cd   :  { %v2798_v22 = vpop.permute.xlu1 %2797  ;;  %2731 = vmatprep.mubr.bf16.mxu1 %v3332_v58  ;;  %v2636_v18 = vpop.permute.xlu0 %2635 }
 0x2ce   :  { %v2641_v19 = vsel %vm411_vm5, %v2634_v2, %v2636_v18  ;;  %v2642_v31 = vsel %vm411_vm5, %v2636_v18, %v2638_v63  ;;  %v2805_v34 = vsel %vm122_vm3, %v2796_v16, %v2798_v22 }
 0x2cf   :  { %v2653_v33 = vsel %vm74_vm4, %v2641_v19, 0  ;;  %3217 = vmatmul.mubr.msk.bf16.vlgmr.msra.gmra.mxu0 %vm1728_vm1, %v3215_v27  ;;  %3218 = vmatprep.subr.msk.bf16.mxu1 %vm74_vm4, %v2642_v31  ;;  %v2813_v37 = vsel %vm74_vm4, %v2805_v34, 0 }
 0x2d0   :  { %2714 = vmatpush1.bf16.msra.mxu1 %v2653_v33  ;;  %2856 = vmatprep.mubr.bf16.mxu0 %v3332_v58 }
 0x2d1   :  { %v2962_v24 = vpop.permute.xlu1 %2961  ;;  %v2800_v20 = vpop.permute.xlu0 %2799 }
 0x2d2   :  { %v2806_v32 = vsel %vm122_vm3, %v2798_v22, %v2800_v20 }
 0x2d3   :  { %3222 = vmatprep.subr.msk.bf16.mxu0 %vm74_vm4, %v2806_v32 }
 0x2d4   :  { %3219 = vmatmul.mubr.msk.bf16.vlgmr.msra.gmra.mxu1 %vm1728_vm1, %v3215_v27  ;;  %2839 = vmatpush1.bf16.msra.mxu0 %v2813_v37 }
 0x2d5   :  { %v2802_v26 = vpop.permute.xlu1 %2801  ;;  %2897 = vmatprep.mubr.bf16.mxu1 %v3332_v58  ;;  %v2804_v35 = vpop.permute.xlu0 %2803 }
 0x2d6   :  { %v2807_v30 = vsel %vm122_vm3, %v2800_v20, %v2802_v26  ;;  %v2808_v41 = vsel %vm122_vm3, %v2802_v26, %v2804_v35 }
 0x2d7   :  { %v2819_v28 = vsel %vm74_vm4, %v2807_v30, 0  ;;  %3223 = vmatmul.mubr.msk.bf16.vlgmr.msra.gmra.mxu0 %vm1728_vm1, %v3221_v38  ;;  %3224 = vmatprep.subr.msk.bf16.mxu1 %vm74_vm4, %v2808_v41 }
 0x2d8   :  { %2880 = vmatpush1.bf16.msra.mxu1 %v2819_v28  ;;  %3022 = vmatprep.mubr.bf16.mxu0 %v3332_v58 }
 0x2d9   :  { %v2966_v39 = vpop.permute.xlu1 %2965  ;;  %v2964_v6 = vpop.permute.xlu0 %2963 }
 0x2da   :  { %v2971_v42 = vsel %vm72_vm2, %v2962_v24, %v2964_v6  ;;  %v2972_v44 = vsel %vm72_vm2, %v2964_v6, %v2966_v39 }
 0x2db   :  { %v2979_v5 = vsel %vm74_vm4, %v2971_v42, 0  ;;  %3228 = vmatprep.subr.msk.bf16.mxu0 %vm74_vm4, %v2972_v44 }
 0x2dc   :  { %3225 = vmatmul.mubr.msk.bf16.vlgmr.msra.gmra.mxu1 %vm1728_vm1, %v3221_v38  ;;  %3005 = vmatpush1.bf16.msra.mxu0 %v2979_v5 }
 0x2dd   :  { %v2970_v49 = vpop.permute.xlu1 %2969  ;;  %3063 = vmatprep.mubr.bf16.mxu1 %v3332_v58  ;;  %v2968_v29 = vpop.permute.xlu0 %2967 }
 0x2de   :  { %v2973_v50 = vsel %vm72_vm2, %v2966_v39, %v2968_v29  ;;  %v2974_v56 = vsel %vm72_vm2, %v2968_v29, %v2970_v49 }
 0x2df   :  { %v2985_v1 = vsel %vm74_vm4, %v2973_v50, 0  ;;  %3229 = vmatmul.mubr.msk.bf16.vlgmr.msra.gmra.mxu0 %vm1728_vm1, %v3227_v45  ;;  %3230 = vmatprep.subr.msk.bf16.mxu1 %vm74_vm4, %v2974_v56 }
 0x2e0   :  { %3046 = vmatpush1.bf16.msra.mxu1 %v2985_v1 }
 0x2e4   :  { %3231 = vmatmul.mubr.msk.bf16.vlgmr.msra.gmra.mxu1 %vm1728_vm1, %v3227_v45 }
 0x35f   :  { %v1778_v60 = vpop.f32.mrf.mxu0 }
 0x361   :  { %v1780_v40 = vpop.f32.mrf.mxu0 }
 0x363   :  { %v1782_v36 = vpop.f32.mrf.mxu0 }
 0x364   :  { %v1819_v8 = vpop.f32.mrf.mxu1 }
 0x365   :  { %v1783_v7 = vpop.f32.mrf.mxu0 }
 0x366   :  { %v1821_v58 = vpop.f32.mrf.mxu1 }
 0x367   :  { %v1894_v0 = vpop.f32.mrf.mxu0 }
 0x368   :  { %v1823_v62 = vpop.f32.mrf.mxu1  ;;  %v1895_v28 = vadd.f32 %v1894_v0, %v1778_v60 }
 0x369   :  { %v1896_v9 = vpop.f32.mrf.mxu0 }
 0x36a   :  { %v1824_v3 = vpop.f32.mrf.mxu1  ;;  %v1897_v41 = vadd.f32 %v1896_v9, %v1780_v40 }
 0x36b   :  { %v1898_v11 = vpop.f32.mrf.mxu0 }
 0x36c   :  { %v1935_v15 = vpop.f32.mrf.mxu1 }
 0x36d   :  { %v1899_v55 = vpop.f32.mrf.mxu0  ;;  %v1936_v5 = vadd.f32 %v1935_v15, %v1819_v8 }
 0x36e   :  { %v1937_v13 = vpop.f32.mrf.mxu1 }
 0x36f   :  { %v2056_v21 = vpop.f32.mrf.mxu0  ;;  %v1938_v56 = vadd.f32 %v1937_v13, %v1821_v58 }
 0x370   :  { %v1939_v17 = vpop.f32.mrf.mxu1  ;;  %v2104_v6 = vadd.f32 %v2056_v21, %v1895_v28 }
 0x371   :  { %v2058_v57 = vpop.f32.mrf.mxu0 }
 0x372   :  { %v1940_v48 = vpop.f32.mrf.mxu1  ;;  %v2105_v49 = vadd.f32 %v2058_v57, %v1897_v41 }
 0x373   :  { %v2060_v43 = vpop.f32.mrf.mxu0 }
 0x374   :  { %v2097_v47 = vpop.f32.mrf.mxu1 }
 0x375   :  { %v2061_v51 = vpop.f32.mrf.mxu0  ;;  %v2106_v1 = vadd.f32 %v2097_v47, %v1936_v5 }
 0x376   :  { %v2099_v2 = vpop.f32.mrf.mxu1 }
 0x377   :  { %v2222_v52 = vpop.f32.mrf.mxu0  ;;  %v2107_v11 = vadd.f32 %v2099_v2, %v1938_v56 }
 0x378   :  { %v2101_v23 = vpop.f32.mrf.mxu1  ;;  %v2270_v45 = vadd.f32 %v2222_v52, %v2104_v6 }
 0x379   :  { %v2224_v61 = vpop.f32.mrf.mxu0 }
 0x37a   :  { %v2102_v53 = vpop.f32.mrf.mxu1  ;;  %v2271_v36 = vadd.f32 %v2224_v61, %v2105_v49 }
 0x37b   :  { %v2226_v4 = vpop.f32.mrf.mxu0 }
 0x37c   :  { %v2263_v14 = vpop.f32.mrf.mxu1 }
 0x37d   :  { %v2227_v25 = vpop.f32.mrf.mxu0  ;;  %v2272_v55 = vadd.f32 %v2263_v14, %v2106_v1 }
 0x37e   :  { %v2265_v54 = vpop.f32.mrf.mxu1  ;;  %v3084_v25 = vpop.permute.xlu0 %3083 }
 0x37f   :  { %v2355_v63 = vpop.f32.mrf.mxu0  ;;  %v2273_v9 = vadd.f32 %v2265_v54, %v2107_v11 }
 0x380   :  { %v2267_v12 = vpop.f32.mrf.mxu1  ;;  %v2403_v7 = vadd.f32 %v2355_v63, %v2270_v45 }
 0x381   :  { %v2357_v46 = vpop.f32.mrf.mxu0 }
 0x382   :  { %v2268_v59 = vpop.f32.mrf.mxu1  ;;  %v2404_v60 = vadd.f32 %v2357_v46, %v2271_v36 }
 0x383   :  { %v2359_v10 = vpop.f32.mrf.mxu0 }
 0x384   :  { %v2396_v16 = vpop.f32.mrf.mxu1 }
 0x385   :  { %v2360_v22 = vpop.f32.mrf.mxu0  ;;  %v2405_v21 = vadd.f32 %v2396_v16, %v2272_v55 }
 0x386   :  { %v2398_v27 = vpop.f32.mrf.mxu1 }
 0x387   :  { %v2526_v24 = vpop.f32.mrf.mxu0  ;;  %v2406_v43 = vadd.f32 %v2398_v27, %v2273_v9 }
 0x388   :  { %v2400_v18 = vpop.f32.mrf.mxu1  ;;  %v2574_v0 = vadd.f32 %v2526_v24, %v2403_v7 }
 0x389   :  { %v2528_v31 = vpop.f32.mrf.mxu0 }
 0x38a   :  { %v2401_v19 = vpop.f32.mrf.mxu1  ;;  %v2575_v48 = vadd.f32 %v2528_v31, %v2404_v60 }
 0x38b   :  { %v2530_v33 = vpop.f32.mrf.mxu0 }
 0x38c   :  { %v2567_v34 = vpop.f32.mrf.mxu1 }
 0x38d   :  { %v2531_v20 = vpop.f32.mrf.mxu0  ;;  %v2576_v51 = vadd.f32 %v2567_v34, %v2405_v21 }
 0x38e   :  { %v2569_v26 = vpop.f32.mrf.mxu1 }
 0x38f   :  { %v2692_v30 = vpop.f32.mrf.mxu0  ;;  %v2577_v52 = vadd.f32 %v2569_v26, %v2406_v43 }
 0x390   :  { %v2571_v32 = vpop.f32.mrf.mxu1  ;;  %v2740_v8 = vadd.f32 %v2692_v30, %v2574_v0 }
 0x391   :  { %v2694_v38 = vpop.f32.mrf.mxu0 }
 0x392   :  { %v2572_v37 = vpop.f32.mrf.mxu1  ;;  %v2741_v58 = vadd.f32 %v2694_v38, %v2575_v48 }
 0x393   :  { %v2696_v35 = vpop.f32.mrf.mxu0 }
 0x394   :  { %v2733_v39 = vpop.f32.mrf.mxu1 }
 0x395   :  { %v2697_v42 = vpop.f32.mrf.mxu0  ;;  %v2742_v53 = vadd.f32 %v2733_v39, %v2576_v51 }
 0x396   :  { %v2735_v44 = vpop.f32.mrf.mxu1 }
 0x397   :  { %v2858_v50 = vpop.f32.mrf.mxu0  ;;  %v2743_v12 = vadd.f32 %v2735_v44, %v2577_v52 }
 0x398   :  { %v2737_v29 = vpop.f32.mrf.mxu1  ;;  %v2906_v13 = vadd.f32 %v2858_v50, %v2740_v8 }
 0x399   :  { %v2860_v3 = vpop.f32.mrf.mxu0 }
 0x39a   :  { %v2738_v62 = vpop.f32.mrf.mxu1  ;;  %v2907_v2 = vadd.f32 %v2860_v3, %v2741_v58 }
 0x39b   :  { %v2862_v17 = vpop.f32.mrf.mxu0 }
 0x39c   :  { %v2899_v40 = vpop.f32.mrf.mxu1 }
 0x39d   :  { %v2863_v15 = vpop.f32.mrf.mxu0  ;;  %v2908_v54 = vadd.f32 %v2899_v40, %v2742_v53 }
 0x39e   :  { %v2901_v57 = vpop.f32.mrf.mxu1 }
 0x39f   :  { %v3024_v23 = vpop.f32.mrf.mxu0  ;;  %v2909_v16 = vadd.f32 %v2901_v57, %v2743_v12 }
 0x3a0   :  { %v2903_v47 = vpop.f32.mrf.mxu1  ;;  %v3072_v61 = vadd.f32 %v3024_v23, %v2906_v13 }
 0x3a1   :  { %v3026_v14 = vpop.f32.mrf.mxu0 }
 0x3a2   :  { %v2904_v4 = vpop.f32.mrf.mxu1  ;;  %v3076_v63 = vmul.f32 0.0002706242, %v3072_v61  ;;  %v3073_v59 = vadd.f32 %v3026_v14, %v2907_v2 }
 0x3a3   :  { %v3028_v10 = vpop.f32.mrf.mxu0 }
 0x3a4   :  { %v3065_v46 = vpop.f32.mrf.mxu1  ;;  %v3086_v22 = vadd.f32 %v3084_v25, %v3076_v63  ;;  %v3077_v27 = vmul.f32 0.0002706242, %v3073_v59 }
 0x3a5   :  { %v3074_v18 = vadd.f32 %v3065_v46, %v2908_v54  ;;  %v3029_v19 = vpop.f32.mrf.mxu0 }
 0x3a6   :  { %v3067_v24 = vpop.f32.mrf.mxu1  ;;  %v3090_v31 = vmax.f32 %v3086_v22, 0.0  ;;  %v3087_v33 = vadd.f32 %v3084_v25, %v3077_v27 }
 0x3a7   :  { %v3078_v34 = vmul.f32 0.0002706242, %v3074_v18  ;;  %v3075_v20 = vadd.f32 %v3067_v24, %v2909_v16 }
 0x3a8   :  { %v3069_v26 = vpop.f32.mrf.mxu1  ;;  %v3094_v32 = vmul.f32 20.0, %v3090_v31  ;;  %v3091_v30 = vmax.f32 %v3087_v33, 0.0 }
 0x3a9   :  { %v3088_v37 = vadd.f32 %v3084_v25, %v3078_v34  ;;  %v3079_v38 = vmul.f32 0.0002706242, %v3075_v20 }
 0x3aa   :  { %v3070_v28 = vpop.f32.mrf.mxu1  ;;  %v3282_v35 = vcvt.f32.s32 %v3094_v32  ;;  %v3095_v39 = vmul.f32 20.0, %v3091_v30  ;;  %v3280_v5 = vand.u32 2147483647, %v3094_v32  ;;  %v3285_v50 = vand.u32 2147483648, %v3094_v32 }
 0x3ab   :  { %v3092_v41 = vmax.f32 %v3088_v37, 0.0  ;;  %v3089_v6 = vadd.f32 %v3084_v25, %v3079_v38 }
 0x3ac   :  { %v3283_v42 = vcvt.s32.f32 %v3282_v35  ;;  %v3290_v44 = vcvt.f32.s32 %v3095_v39  ;;  %v3288_v56 = vand.u32 2147483647, %v3095_v39  ;;  %v3293_v11 = vand.u32 2147483648, %v3095_v39 }
 0x3ad   :  { %v3096_v49 = vmul.f32 20.0, %v3092_v41  ;;  %v3093_v45 = vmax.f32 %v3089_v6, 0.0  ;;  %vm3281_vm2 = vcmp.lt.f32.partialorder %v3280_v5, 8388608.0 }
 0x3ae   :  { %v3284_v29 = vand.u32 2147483647, %v3283_v42  ;;  %v3291_v1 = vcvt.s32.f32 %v3290_v44  ;;  %vm3289_vm3 = vcmp.lt.f32.partialorder %v3288_v56, 8388608.0 }
 0x3af   :  { %v3298_v36 = vcvt.f32.s32 %v3096_v49  ;;  %v3097_v7 = vmul.f32 20.0, %v3093_v45  ;;  %v3296_v40 = vand.u32 2147483647, %v3096_v49  ;;  %v3301_v48 = vand.u32 2147483648, %v3096_v49 }
 0x3b0   :  { %v3286_v62 = vor.u32 %v3285_v50, %v3284_v29  ;;  %v3292_v3 = vand.u32 2147483647, %v3291_v1 }
 0x3b1   :  { %v3299_v55 = vcvt.s32.f32 %v3298_v36  ;;  %v3306_v60 = vcvt.f32.s32 %v3097_v7  ;;  %v3304_v57 = vand.u32 2147483647, %v3097_v7  ;;  %v3309_v43 = vand.u32 2147483648, %v3097_v7 }
 0x3b2   :  { %v3287_v0 = vsel %vm3281_vm2, %v3286_v62, %v3094_v32  ;;  %v3294_v17 = vor.u32 %v3293_v11, %v3292_v3  ;;  %vm3297_vm4 = vcmp.lt.f32.partialorder %v3296_v40, 8388608.0 }
 0x3b3   :  { %v3106_v9 = vmax.f32 %v3287_v0, 0.0  ;;  %v3300_v21 = vand.u32 2147483647, %v3299_v55  ;;  %v3307_v8 = vcvt.s32.f32 %v3306_v60  ;;  %vm3305_vm5 = vcmp.lt.f32.partialorder %v3304_v57, 8388608.0 }
 0x3b4   :  { %v3295_v15 = vsel %vm3289_vm3, %v3294_v17, %v3095_v39 }
 0x3b5   :  { %v3110_v51 = vmin.f32 %v3106_v9, 255.0  ;;  %v3107_v58 = vmax.f32 %v3295_v15, 0.0  ;;  %v3302_v13 = vor.u32 %v3301_v48, %v3300_v21  ;;  %v3308_v47 = vand.u32 2147483647, %v3307_v8 }
 0x3b7   :  { %v3114_v23 = vmul.f32 0.05, %v3110_v51  ;;  %v3111_v52 = vmin.f32 %v3107_v58, 255.0  ;;  %v3303_v53 = vsel %vm3297_vm4, %v3302_v13, %v3096_v49  ;;  %v3310_v2 = vor.u32 %v3309_v43, %v3308_v47 }
 0x3b8   :  { %v3108_v61 = vmax.f32 %v3303_v53, 0.0 }
 0x3b9   :  { %3118 = vst [vmem:[%s4097_s6] sm:$0xff] %v3114_v23  ;;  %v3115_v4 = vmul.f32 0.05, %v3111_v52  ;;  %v3311_v14 = vsel %vm3305_vm5, %v3310_v2, %v3097_v7 }
 0x3ba   :  { %v3112_v25 = vmin.f32 %v3108_v61, 255.0  ;;  %v3109_v12 = vmax.f32 %v3311_v14, 0.0 }
 0x3bb   :  { %3119 = vst [vmem:[%s4097_s6 + $0x8] sm:$0xff] %v3115_v4 }
 0x3bc   :  { %v3116_v54 = vmul.f32 0.05, %v3112_v25  ;;  %v3113_v63 = vmin.f32 %v3109_v12, 255.0 }
 0x3be   :  { %3120 = vst [vmem:[%s4097_s6 + $0x10] sm:$0xff] %v3116_v54  ;;  %v3117_v59 = vmul.f32 0.05, %v3113_v63 }
 0x3c0   :  { %3121 = vst [vmem:[%s4097_s6 + $0x18] sm:$0xff] %v3117_v59 }

</bundles_post_ra>
